<compile_context>
chip_gen: v6e
topology: v6e:2x2x1
jax: 0.10.0
libtpu: 0.0.40
codegen_flags: <defaults>
</compile_context>

<pallas_src>
import functools

import numpy as np
import jax
import jax.numpy as jnp
from jax.experimental import pallas as pl
from jax.experimental.pallas import tpu as pltpu

# DQN conv stack fixed by the PyTorch spec: (out_channels, kernel, stride)
_CONV1 = (32, 8, 4)
_CONV2 = (64, 4, 2)
_CONV3 = (64, 3, 1)
_FC_HIDDEN = 512


def _out_hw(h, w, k, s):
    return (h - k) // s + 1, (w - k) // s + 1


# ------------------------------ fused kernel ------------------------------ #

def _dqn_fused_kernel(p1_ref, w1_ref, b1_ref,
                      s2_ref, w2_ref, b2_ref,
                      s3_ref, w3_ref, b3_ref,
                      wl1_ref, bl1_ref, wl2_ref, bl2_ref,
                      o_ref):
    f32, bf16 = jnp.float32, jnp.bfloat16

    def conv_taps(h_in, sel_ref, w_ref, b_ref):
        # conv as a sum over kernel taps:  out = relu( sum_t (S_t @ h) @ W_t + b )
        # S_t is a constant 0/1 row-selection matrix -> in-kernel im2col row
        # gather done on the MXU (exact: one nonzero per output row).
        acc = None
        for t in range(sel_ref.shape[0]):
            g = jnp.dot(sel_ref[t], h_in, preferred_element_type=f32)
            part = jnp.dot(g.astype(bf16), w_ref[t], preferred_element_type=f32)
            acc = part if acc is None else acc + part
        return jnp.maximum(acc + b_ref[...], 0.0).astype(bf16)

    # conv1: patches were built by the jit-fused wrapper (HBM input read once).
    h1 = jnp.dot(p1_ref[...], w1_ref[...], preferred_element_type=f32)
    h1 = jnp.maximum(h1 + b1_ref[...], 0.0).astype(bf16)        # [B*H1*W1, 32]

    h2 = conv_taps(h1, s2_ref, w2_ref, b2_ref)                  # [B*H2*W2, 64]
    h3 = conv_taps(h2, s3_ref, w3_ref, b3_ref)                  # [B, 64] (1x1 spatial)

    h4 = jnp.dot(h3, wl1_ref[...], preferred_element_type=f32)
    h4 = jnp.maximum(h4 + bl1_ref[...], 0.0).astype(bf16)       # [B, 512]

    h5 = jnp.dot(h4, wl2_ref[...], preferred_element_type=f32) + bl2_ref[...]
    o_ref[...] = h5.astype(o_ref.dtype)                         # [B, 128] lane-dense


# ------------------------- wrapper-side helpers ---------------------------- #

def _im2col_conv1(x_nchw, k, stride):
    """Conv1 patch matrix: rows ordered (n, oh, ow), features ordered (C, kh, kw)."""
    N, C, H, W = x_nchw.shape
    Ho, Wo = _out_hw(H, W, k, stride)
    patches = []
    for i in range(k):
        for j in range(k):
            patches.append(
                x_nchw[:, :, i:i + stride * Ho:stride, j:j + stride * Wo:stride])
    p = jnp.stack(patches, axis=0).reshape(k, k, N, C, Ho, Wo)
    p = p.transpose(2, 4, 5, 3, 0, 1).reshape(N * Ho * Wo, C * k * k)
    return p


def _conv_row_selection(batch, h_in, w_in, k, stride):
    """Constant 0/1 matrices S[t, r_out, r_in] used for in-kernel im2col gather."""
    h_out, w_out = _out_hw(h_in, w_in, k, stride)
    sel = np.zeros((k * k, batch * h_out * w_out, batch * h_in * w_in), np.float32)
    for i in range(k):
        for j in range(k):
            t = i * k + j
            for n in range(batch):
                for oh in range(h_out):
                    for ow in range(w_out):
                        r_out = (n * h_out + oh) * w_out + ow
                        r_in = (n * h_in + oh * stride + i) * w_in + (ow * stride + j)
                        sel[t, r_out, r_in] = 1.0
    return sel, h_out, w_out


def _stack_conv_weight(w_oihw):
    """(O, C, kh, kw) torch conv weight -> per-tap matmul operands [kh*kw, C, O]."""
    O, C, kh, kw = w_oihw.shape
    return jnp.transpose(w_oihw, (2, 3, 1, 0)).reshape(kh * kw, C, O)


def prepare_params(params, batch, in_hw):
    """One-time preprocessing (hoisted out of the forward pass): pre-transposed
    bf16 [K, N] weights, f32 [1, N] biases, lane-padded FC2, and constant
    selection matrices for the in-kernel conv2/conv3 im2col."""
    f32, bf16 = jnp.float32, jnp.bfloat16
    H, W = in_hw
    _, k1, st1 = _CONV1
    _, k2, st2 = _CONV2
    _, k3, st3 = _CONV3

    h1, w1 = _out_hw(H, W, k1, st1)
    sel2, h2, w2 = _conv_row_selection(batch, h1, w1, k2, st2)
    sel3, h3, w3 = _conv_row_selection(batch, h2, w2, k3, st3)
    # TODO(synk): generalize the conv->FC flatten for final spatial maps > 1x1
    # (the 36x36 DQN config used here ends at 1x1, matching torch .view order).
    assert h3 * w3 == 1, "fused kernel assumes the conv stack ends at 1x1 spatial"

    n_act = params["wl2"].shape[0]
    n_pad = ((n_act + 127) // 128) * 128          # lane-dense output width
    o1 = params["w1"].shape[0]

    wl2_pad = jnp.zeros((params["wl2"].shape[1], n_pad), f32)
    wl2_pad = wl2_pad.at[:, :n_act].set(params["wl2"].T)
    bl2_pad = jnp.zeros((1, n_pad), f32).at[0, :n_act].set(params["bl2"])

    return {
        "w1": params["w1"].reshape(o1, -1).T.astype(bf16),    # [C*k1*k1, 32]
        "b1": params["b1"].reshape(1, -1).astype(f32),
        "s2": jnp.asarray(sel2, bf16),                         # [k2*k2, B*h2*w2, B*h1*w1]
        "w2": _stack_conv_weight(params["w2"]).astype(bf16),   # [k2*k2, 32, 64]
        "b2": params["b2"].reshape(1, -1).astype(f32),
        "s3": jnp.asarray(sel3, bf16),                         # [k3*k3, B, B*h2*w2]
        "w3": _stack_conv_weight(params["w3"]).astype(bf16),   # [k3*k3, 64, 64]
        "b3": params["b3"].reshape(1, -1).astype(f32),
        "wl1": params["wl1"].T.astype(bf16),                   # [64, 512]
        "bl1": params["bl1"].reshape(1, -1).astype(f32),
        "wl2": wl2_pad.astype(bf16),                           # [512, n_pad]
        "bl2": bl2_pad,                                        # [1, n_pad] f32
    }


def _full_spec(arr):
    nd = arr.ndim
    return pl.BlockSpec(arr.shape, lambda i, _nd=nd: (0,) * _nd)


@functools.partial(jax.jit, static_argnames=("num_actions",))
def dqn_forward(prep, x_nchw, *, num_actions):
    batch = x_nchw.shape[0]
    _, k1, st1 = _CONV1
    # conv1 im2col stays in the jit-fused wrapper (input must come from HBM once);
    # every layer after that runs on VMEM-resident data inside the fused kernel.
    p1 = _im2col_conv1(x_nchw.astype(jnp.float32), k1, st1).astype(jnp.bfloat16)

    operands = (p1, prep["w1"], prep["b1"],
                prep["s2"], prep["w2"], prep["b2"],
                prep["s3"], prep["w3"], prep["b3"],
                prep["wl1"], prep["bl1"], prep["wl2"], prep["bl2"])
    n_pad = prep["wl2"].shape[1]

    out_padded = pl.pallas_call(
        _dqn_fused_kernel,
        out_shape=jax.ShapeDtypeStruct((batch, n_pad), jnp.float32),
        grid=(1,),
        in_specs=[_full_spec(a) for a in operands],
        out_specs=pl.BlockSpec((batch, n_pad), lambda i: (0, 0)),
        compiler_params=pltpu.CompilerParams(
            dimension_semantics=("arbitrary",)),
    )(*operands)
    return out_padded[:, :num_actions]


# --------------------------- params & reference ---------------------------- #

def init_params(key, channels, num_actions):
    ks = jax.random.split(key, 10)
    s = 0.05

    def nrm(k, shape):
        return jax.random.normal(k, shape, jnp.float32) * s

    return {
        "w1": nrm(ks[0], (32, channels, 8, 8)), "b1": nrm(ks[1], (32,)),
        "w2": nrm(ks[2], (64, 32, 4, 4)),       "b2": nrm(ks[3], (64,)),
        "w3": nrm(ks[4], (64, 64, 3, 3)),       "b3": nrm(ks[5], (64,)),
        # Linear weights stored PyTorch-style: (out_features, in_features)
        "wl1": nrm(ks[6], (_FC_HIDDEN, 64)),           "bl1": nrm(ks[7], (_FC_HIDDEN,)),
        "wl2": nrm(ks[8], (num_actions, _FC_HIDDEN)),  "bl2": nrm(ks[9], (num_actions,)),
    }


def dqn_reference(params, x):
    def conv(x, w, b, s):
        y = jax.lax.conv_general_dilated(
            x, w, (s, s), "VALID", dimension_numbers=("NCHW", "OIHW", "NCHW"))
        return jnp.maximum(y + b[None, :, None, None], 0.0)

    x = conv(x, params["w1"], params["b1"], 4)
    x = conv(x, params["w2"], params["b2"], 2)
    x = conv(x, params["w3"], params["b3"], 1)
    x = x.reshape(x.shape[0], -1)
    x = jnp.maximum(x @ params["wl1"].T + params["bl1"], 0.0)
    return x @ params["wl2"].T + params["bl2"]


# --------------------------------- main ------------------------------------ #

if __name__ == "__main__":
    # in_shape = [channels, width, height] = [4, 36, 36], num_actions = 4
    # conv pipeline: 36 -> 8 -> 3 -> 1   (conv_output_size = 64*1*1 = 64)
    batch, channels, side, num_actions = 2, 4, 36, 4

    key = jax.random.PRNGKey(0)
    pkey, xkey = jax.random.split(key)
    params = init_params(pkey, channels, num_actions)
    x = jax.random.normal(xkey, (batch, channels, side, side), jnp.float32)

    prep = prepare_params(params, batch, (side, side))

    out = jax.block_until_ready(dqn_forward(prep, x, num_actions=num_actions))
    assert out.shape == (batch, num_actions), out.shape

    ref = jax.block_until_ready(dqn_reference(params, x))
    max_err = float(jnp.max(jnp.abs(out - ref)))
    assert jnp.allclose(out, ref, rtol=2e-2, atol=2e-2), (
        "mismatch vs reference: max abs err = %g" % max_err)

    print("KERNEL_OK")
</pallas_src>

<mosaic_0001>
module attributes {stable_mosaic.version = 11 : i64} {
  func.func @_dqn_fused_kernel(%arg0: i32, %arg1: memref<128x256xbf16, #tpu.memory_space<vmem>>, %arg2: memref<256x32xbf16, #tpu.memory_space<vmem>>, %arg3: memref<1x32xf32, #tpu.memory_space<vmem>>, %arg4: memref<16x18x128xbf16, #tpu.memory_space<vmem>>, %arg5: memref<16x32x64xbf16, #tpu.memory_space<vmem>>, %arg6: memref<1x64xf32, #tpu.memory_space<vmem>>, %arg7: memref<9x2x18xbf16, #tpu.memory_space<vmem>>, %arg8: memref<9x64x64xbf16, #tpu.memory_space<vmem>>, %arg9: memref<1x64xf32, #tpu.memory_space<vmem>>, %arg10: memref<64x512xbf16, #tpu.memory_space<vmem>>, %arg11: memref<1x512xf32, #tpu.memory_space<vmem>>, %arg12: memref<512x128xbf16, #tpu.memory_space<vmem>>, %arg13: memref<1x128xf32, #tpu.memory_space<vmem>>, %arg14: memref<2x128xf32, #tpu.memory_space<vmem>>) attributes {dimension_semantics = [#tpu.dimension_semantics<arbitrary>], iteration_bounds = array<i64: 1>, scalar_prefetch = 0 : i64, scratch_operands = 0 : i64, tpu.core_type = #tpu.core_type<tc>, window_params = [{pipeline_mode = #tpu.pipeline_mode<synchronous>, transform_indices = @transform_0, window_bounds = array<i64: 128, 256>}, {pipeline_mode = #tpu.pipeline_mode<synchronous>, transform_indices = @transform_1, window_bounds = array<i64: 256, 32>}, {pipeline_mode = #tpu.pipeline_mode<synchronous>, transform_indices = @transform_2, window_bounds = array<i64: 1, 32>}, {pipeline_mode = #tpu.pipeline_mode<synchronous>, transform_indices = @transform_3, window_bounds = array<i64: 16, 18, 128>}, {pipeline_mode = #tpu.pipeline_mode<synchronous>, transform_indices = @transform_4, window_bounds = array<i64: 16, 32, 64>}, {pipeline_mode = #tpu.pipeline_mode<synchronous>, transform_indices = @transform_5, window_bounds = array<i64: 1, 64>}, {pipeline_mode = #tpu.pipeline_mode<synchronous>, transform_indices = @transform_6, window_bounds = array<i64: 9, 2, 18>}, {pipeline_mode = #tpu.pipeline_mode<synchronous>, transform_indices = @transform_7, window_bounds = array<i64: 9, 64, 64>}, {pipeline_mode = #tpu.pipeline_mode<synchronous>, transform_indices = @transform_8, window_bounds = array<i64: 1, 64>}, {pipeline_mode = #tpu.pipeline_mode<synchronous>, transform_indices = @transform_9, window_bounds = array<i64: 64, 512>}, {pipeline_mode = #tpu.pipeline_mode<synchronous>, transform_indices = @transform_10, window_bounds = array<i64: 1, 512>}, {pipeline_mode = #tpu.pipeline_mode<synchronous>, transform_indices = @transform_11, window_bounds = array<i64: 512, 128>}, {pipeline_mode = #tpu.pipeline_mode<synchronous>, transform_indices = @transform_12, window_bounds = array<i64: 1, 128>}, {pipeline_mode = #tpu.pipeline_mode<synchronous>, transform_indices = @transform_13, window_bounds = array<i64: 2, 128>}]} {
    %c0 = arith.constant 0 : index
    %c0_0 = arith.constant 0 : index
    %0 = vector.load %arg1[%c0, %c0_0] : memref<128x256xbf16, #tpu.memory_space<vmem>>, vector<128x256xbf16>
    %c0_1 = arith.constant 0 : index
    %c0_2 = arith.constant 0 : index
    %1 = vector.load %arg2[%c0_1, %c0_2] : memref<256x32xbf16, #tpu.memory_space<vmem>>, vector<256x32xbf16>
    %cst = arith.constant dense<0.000000e+00> : vector<128x32xf32>
    %2 = tpu.matmul %0, %1, %cst {dimension_numbers = #tpu.dot_dimension_numbers<[1], [0], [0], [1], [0, 0, 1, 1], [], []>} : vector<128x256xbf16>, vector<256x32xbf16>, vector<128x32xf32> -> vector<128x32xf32>
    %c0_3 = arith.constant 0 : index
    %c0_4 = arith.constant 0 : index
    %3 = vector.load %arg3[%c0_3, %c0_4] : memref<1x32xf32, #tpu.memory_space<vmem>>, vector<1x32xf32>
    %4 = vector.broadcast %3 : vector<1x32xf32> to vector<128x32xf32>
    %5 = arith.addf %2, %4 : vector<128x32xf32>
    %cst_5 = arith.constant 0.000000e+00 : f32
    %6 = vector.broadcast %cst_5 : f32 to vector<128x32xf32>
    %7 = arith.maximumf %5, %6 : vector<128x32xf32>
    %8 = arith.truncf %7 : vector<128x32xf32> to vector<128x32xbf16>
    %c0_6 = arith.constant 0 : index
    %c0_7 = arith.constant 0 : index
    %c0_8 = arith.constant 0 : index
    %9 = vector.load %arg4[%c0_6, %c0_7, %c0_8] : memref<16x18x128xbf16, #tpu.memory_space<vmem>>, vector<1x18x128xbf16>
    %10 = vector.shape_cast %9 : vector<1x18x128xbf16> to vector<18x128xbf16>
    %cst_9 = arith.constant dense<0.000000e+00> : vector<18x32xf32>
    %11 = tpu.matmul %10, %8, %cst_9 {dimension_numbers = #tpu.dot_dimension_numbers<[1], [0], [0], [1], [0, 0, 1, 1], [], []>} : vector<18x128xbf16>, vector<128x32xbf16>, vector<18x32xf32> -> vector<18x32xf32>
    %12 = arith.truncf %11 : vector<18x32xf32> to vector<18x32xbf16>
    %c0_10 = arith.constant 0 : index
    %c0_11 = arith.constant 0 : index
    %c0_12 = arith.constant 0 : index
    %13 = vector.load %arg5[%c0_10, %c0_11, %c0_12] : memref<16x32x64xbf16, #tpu.memory_space<vmem>>, vector<1x32x64xbf16>
    %14 = vector.shape_cast %13 : vector<1x32x64xbf16> to vector<32x64xbf16>
    %cst_13 = arith.constant dense<0.000000e+00> : vector<18x64xf32>
    %15 = tpu.matmul %12, %14, %cst_13 {dimension_numbers = #tpu.dot_dimension_numbers<[1], [0], [0], [1], [0, 0, 1, 1], [], []>} : vector<18x32xbf16>, vector<32x64xbf16>, vector<18x64xf32> -> vector<18x64xf32>
    %c1 = arith.constant 1 : index
    %c0_14 = arith.constant 0 : index
    %c0_15 = arith.constant 0 : index
    %16 = vector.load %arg4[%c1, %c0_14, %c0_15] : memref<16x18x128xbf16, #tpu.memory_space<vmem>>, vector<1x18x128xbf16>
    %17 = vector.shape_cast %16 : vector<1x18x128xbf16> to vector<18x128xbf16>
    %cst_16 = arith.constant dense<0.000000e+00> : vector<18x32xf32>
    %18 = tpu.matmul %17, %8, %cst_16 {dimension_numbers = #tpu.dot_dimension_numbers<[1], [0], [0], [1], [0, 0, 1, 1], [], []>} : vector<18x128xbf16>, vector<128x32xbf16>, vector<18x32xf32> -> vector<18x32xf32>
    %19 = arith.truncf %18 : vector<18x32xf32> to vector<18x32xbf16>
    %c1_17 = arith.constant 1 : index
    %c0_18 = arith.constant 0 : index
    %c0_19 = arith.constant 0 : index
    %20 = vector.load %arg5[%c1_17, %c0_18, %c0_19] : memref<16x32x64xbf16, #tpu.memory_space<vmem>>, vector<1x32x64xbf16>
    %21 = vector.shape_cast %20 : vector<1x32x64xbf16> to vector<32x64xbf16>
    %cst_20 = arith.constant dense<0.000000e+00> : vector<18x64xf32>
    %22 = tpu.matmul %19, %21, %cst_20 {dimension_numbers = #tpu.dot_dimension_numbers<[1], [0], [0], [1], [0, 0, 1, 1], [], []>} : vector<18x32xbf16>, vector<32x64xbf16>, vector<18x64xf32> -> vector<18x64xf32>
    %23 = arith.addf %15, %22 : vector<18x64xf32>
    %c2 = arith.constant 2 : index
    %c0_21 = arith.constant 0 : index
    %c0_22 = arith.constant 0 : index
    %24 = vector.load %arg4[%c2, %c0_21, %c0_22] : memref<16x18x128xbf16, #tpu.memory_space<vmem>>, vector<1x18x128xbf16>
    %25 = vector.shape_cast %24 : vector<1x18x128xbf16> to vector<18x128xbf16>
    %cst_23 = arith.constant dense<0.000000e+00> : vector<18x32xf32>
    %26 = tpu.matmul %25, %8, %cst_23 {dimension_numbers = #tpu.dot_dimension_numbers<[1], [0], [0], [1], [0, 0, 1, 1], [], []>} : vector<18x128xbf16>, vector<128x32xbf16>, vector<18x32xf32> -> vector<18x32xf32>
    %27 = arith.truncf %26 : vector<18x32xf32> to vector<18x32xbf16>
    %c2_24 = arith.constant 2 : index
    %c0_25 = arith.constant 0 : index
    %c0_26 = arith.constant 0 : index
    %28 = vector.load %arg5[%c2_24, %c0_25, %c0_26] : memref<16x32x64xbf16, #tpu.memory_space<vmem>>, vector<1x32x64xbf16>
    %29 = vector.shape_cast %28 : vector<1x32x64xbf16> to vector<32x64xbf16>
    %cst_27 = arith.constant dense<0.000000e+00> : vector<18x64xf32>
    %30 = tpu.matmul %27, %29, %cst_27 {dimension_numbers = #tpu.dot_dimension_numbers<[1], [0], [0], [1], [0, 0, 1, 1], [], []>} : vector<18x32xbf16>, vector<32x64xbf16>, vector<18x64xf32> -> vector<18x64xf32>
    %31 = arith.addf %23, %30 : vector<18x64xf32>
    %c3 = arith.constant 3 : index
    %c0_28 = arith.constant 0 : index
    %c0_29 = arith.constant 0 : index
    %32 = vector.load %arg4[%c3, %c0_28, %c0_29] : memref<16x18x128xbf16, #tpu.memory_space<vmem>>, vector<1x18x128xbf16>
    %33 = vector.shape_cast %32 : vector<1x18x128xbf16> to vector<18x128xbf16>
    %cst_30 = arith.constant dense<0.000000e+00> : vector<18x32xf32>
    %34 = tpu.matmul %33, %8, %cst_30 {dimension_numbers = #tpu.dot_dimension_numbers<[1], [0], [0], [1], [0, 0, 1, 1], [], []>} : vector<18x128xbf16>, vector<128x32xbf16>, vector<18x32xf32> -> vector<18x32xf32>
    %35 = arith.truncf %34 : vector<18x32xf32> to vector<18x32xbf16>
    %c3_31 = arith.constant 3 : index
    %c0_32 = arith.constant 0 : index
    %c0_33 = arith.constant 0 : index
    %36 = vector.load %arg5[%c3_31, %c0_32, %c0_33] : memref<16x32x64xbf16, #tpu.memory_space<vmem>>, vector<1x32x64xbf16>
    %37 = vector.shape_cast %36 : vector<1x32x64xbf16> to vector<32x64xbf16>
    %cst_34 = arith.constant dense<0.000000e+00> : vector<18x64xf32>
    %38 = tpu.matmul %35, %37, %cst_34 {dimension_numbers = #tpu.dot_dimension_numbers<[1], [0], [0], [1], [0, 0, 1, 1], [], []>} : vector<18x32xbf16>, vector<32x64xbf16>, vector<18x64xf32> -> vector<18x64xf32>
    %39 = arith.addf %31, %38 : vector<18x64xf32>
    %c4 = arith.constant 4 : index
    %c0_35 = arith.constant 0 : index
    %c0_36 = arith.constant 0 : index
    %40 = vector.load %arg4[%c4, %c0_35, %c0_36] : memref<16x18x128xbf16, #tpu.memory_space<vmem>>, vector<1x18x128xbf16>
    %41 = vector.shape_cast %40 : vector<1x18x128xbf16> to vector<18x128xbf16>
    %cst_37 = arith.constant dense<0.000000e+00> : vector<18x32xf32>
    %42 = tpu.matmul %41, %8, %cst_37 {dimension_numbers = #tpu.dot_dimension_numbers<[1], [0], [0], [1], [0, 0, 1, 1], [], []>} : vector<18x128xbf16>, vector<128x32xbf16>, vector<18x32xf32> -> vector<18x32xf32>
    %43 = arith.truncf %42 : vector<18x32xf32> to vector<18x32xbf16>
    %c4_38 = arith.constant 4 : index
    %c0_39 = arith.constant 0 : index
    %c0_40 = arith.constant 0 : index
    %44 = vector.load %arg5[%c4_38, %c0_39, %c0_40] : memref<16x32x64xbf16, #tpu.memory_space<vmem>>, vector<1x32x64xbf16>
    %45 = vector.shape_cast %44 : vector<1x32x64xbf16> to vector<32x64xbf16>
    %cst_41 = arith.constant dense<0.000000e+00> : vector<18x64xf32>
    %46 = tpu.matmul %43, %45, %cst_41 {dimension_numbers = #tpu.dot_dimension_numbers<[1], [0], [0], [1], [0, 0, 1, 1], [], []>} : vector<18x32xbf16>, vector<32x64xbf16>, vector<18x64xf32> -> vector<18x64xf32>
    %47 = arith.addf %39, %46 : vector<18x64xf32>
    %c5 = arith.constant 5 : index
    %c0_42 = arith.constant 0 : index
    %c0_43 = arith.constant 0 : index
    %48 = vector.load %arg4[%c5, %c0_42, %c0_43] : memref<16x18x128xbf16, #tpu.memory_space<vmem>>, vector<1x18x128xbf16>
    %49 = vector.shape_cast %48 : vector<1x18x128xbf16> to vector<18x128xbf16>
    %cst_44 = arith.constant dense<0.000000e+00> : vector<18x32xf32>
    %50 = tpu.matmul %49, %8, %cst_44 {dimension_numbers = #tpu.dot_dimension_numbers<[1], [0], [0], [1], [0, 0, 1, 1], [], []>} : vector<18x128xbf16>, vector<128x32xbf16>, vector<18x32xf32> -> vector<18x32xf32>
    %51 = arith.truncf %50 : vector<18x32xf32> to vector<18x32xbf16>
    %c5_45 = arith.constant 5 : index
    %c0_46 = arith.constant 0 : index
    %c0_47 = arith.constant 0 : index
    %52 = vector.load %arg5[%c5_45, %c0_46, %c0_47] : memref<16x32x64xbf16, #tpu.memory_space<vmem>>, vector<1x32x64xbf16>
    %53 = vector.shape_cast %52 : vector<1x32x64xbf16> to vector<32x64xbf16>
    %cst_48 = arith.constant dense<0.000000e+00> : vector<18x64xf32>
    %54 = tpu.matmul %51, %53, %cst_48 {dimension_numbers = #tpu.dot_dimension_numbers<[1], [0], [0], [1], [0, 0, 1, 1], [], []>} : vector<18x32xbf16>, vector<32x64xbf16>, vector<18x64xf32> -> vector<18x64xf32>
    %55 = arith.addf %47, %54 : vector<18x64xf32>
    %c6 = arith.constant 6 : index
    %c0_49 = arith.constant 0 : index
    %c0_50 = arith.constant 0 : index
    %56 = vector.load %arg4[%c6, %c0_49, %c0_50] : memref<16x18x128xbf16, #tpu.memory_space<vmem>>, vector<1x18x128xbf16>
    %57 = vector.shape_cast %56 : vector<1x18x128xbf16> to vector<18x128xbf16>
    %cst_51 = arith.constant dense<0.000000e+00> : vector<18x32xf32>
    %58 = tpu.matmul %57, %8, %cst_51 {dimension_numbers = #tpu.dot_dimension_numbers<[1], [0], [0], [1], [0, 0, 1, 1], [], []>} : vector<18x128xbf16>, vector<128x32xbf16>, vector<18x32xf32> -> vector<18x32xf32>
    %59 = arith.truncf %58 : vector<18x32xf32> to vector<18x32xbf16>
    %c6_52 = arith.constant 6 : index
    %c0_53 = arith.constant 0 : index
    %c0_54 = arith.constant 0 : index
    %60 = vector.load %arg5[%c6_52, %c0_53, %c0_54] : memref<16x32x64xbf16, #tpu.memory_space<vmem>>, vector<1x32x64xbf16>
    %61 = vector.shape_cast %60 : vector<1x32x64xbf16> to vector<32x64xbf16>
    %cst_55 = arith.constant dense<0.000000e+00> : vector<18x64xf32>
    %62 = tpu.matmul %59, %61, %cst_55 {dimension_numbers = #tpu.dot_dimension_numbers<[1], [0], [0], [1], [0, 0, 1, 1], [], []>} : vector<18x32xbf16>, vector<32x64xbf16>, vector<18x64xf32> -> vector<18x64xf32>
    %63 = arith.addf %55, %62 : vector<18x64xf32>
    %c7 = arith.constant 7 : index
    %c0_56 = arith.constant 0 : index
    %c0_57 = arith.constant 0 : index
    %64 = vector.load %arg4[%c7, %c0_56, %c0_57] : memref<16x18x128xbf16, #tpu.memory_space<vmem>>, vector<1x18x128xbf16>
    %65 = vector.shape_cast %64 : vector<1x18x128xbf16> to vector<18x128xbf16>
    %cst_58 = arith.constant dense<0.000000e+00> : vector<18x32xf32>
    %66 = tpu.matmul %65, %8, %cst_58 {dimension_numbers = #tpu.dot_dimension_numbers<[1], [0], [0], [1], [0, 0, 1, 1], [], []>} : vector<18x128xbf16>, vector<128x32xbf16>, vector<18x32xf32> -> vector<18x32xf32>
    %67 = arith.truncf %66 : vector<18x32xf32> to vector<18x32xbf16>
    %c7_59 = arith.constant 7 : index
    %c0_60 = arith.constant 0 : index
    %c0_61 = arith.constant 0 : index
    %68 = vector.load %arg5[%c7_59, %c0_60, %c0_61] : memref<16x32x64xbf16, #tpu.memory_space<vmem>>, vector<1x32x64xbf16>
    %69 = vector.shape_cast %68 : vector<1x32x64xbf16> to vector<32x64xbf16>
    %cst_62 = arith.constant dense<0.000000e+00> : vector<18x64xf32>
    %70 = tpu.matmul %67, %69, %cst_62 {dimension_numbers = #tpu.dot_dimension_numbers<[1], [0], [0], [1], [0, 0, 1, 1], [], []>} : vector<18x32xbf16>, vector<32x64xbf16>, vector<18x64xf32> -> vector<18x64xf32>
    %71 = arith.addf %63, %70 : vector<18x64xf32>
    %c8 = arith.constant 8 : index
    %c0_63 = arith.constant 0 : index
    %c0_64 = arith.constant 0 : index
    %72 = vector.load %arg4[%c8, %c0_63, %c0_64] : memref<16x18x128xbf16, #tpu.memory_space<vmem>>, vector<1x18x128xbf16>
    %73 = vector.shape_cast %72 : vector<1x18x128xbf16> to vector<18x128xbf16>
    %cst_65 = arith.constant dense<0.000000e+00> : vector<18x32xf32>
    %74 = tpu.matmul %73, %8, %cst_65 {dimension_numbers = #tpu.dot_dimension_numbers<[1], [0], [0], [1], [0, 0, 1, 1], [], []>} : vector<18x128xbf16>, vector<128x32xbf16>, vector<18x32xf32> -> vector<18x32xf32>
    %75 = arith.truncf %74 : vector<18x32xf32> to vector<18x32xbf16>
    %c8_66 = arith.constant 8 : index
    %c0_67 = arith.constant 0 : index
    %c0_68 = arith.constant 0 : index
    %76 = vector.load %arg5[%c8_66, %c0_67, %c0_68] : memref<16x32x64xbf16, #tpu.memory_space<vmem>>, vector<1x32x64xbf16>
    %77 = vector.shape_cast %76 : vector<1x32x64xbf16> to vector<32x64xbf16>
    %cst_69 = arith.constant dense<0.000000e+00> : vector<18x64xf32>
    %78 = tpu.matmul %75, %77, %cst_69 {dimension_numbers = #tpu.dot_dimension_numbers<[1], [0], [0], [1], [0, 0, 1, 1], [], []>} : vector<18x32xbf16>, vector<32x64xbf16>, vector<18x64xf32> -> vector<18x64xf32>
    %79 = arith.addf %71, %78 : vector<18x64xf32>
    %c9 = arith.constant 9 : index
    %c0_70 = arith.constant 0 : index
    %c0_71 = arith.constant 0 : index
    %80 = vector.load %arg4[%c9, %c0_70, %c0_71] : memref<16x18x128xbf16, #tpu.memory_space<vmem>>, vector<1x18x128xbf16>
    %81 = vector.shape_cast %80 : vector<1x18x128xbf16> to vector<18x128xbf16>
    %cst_72 = arith.constant dense<0.000000e+00> : vector<18x32xf32>
    %82 = tpu.matmul %81, %8, %cst_72 {dimension_numbers = #tpu.dot_dimension_numbers<[1], [0], [0], [1], [0, 0, 1, 1], [], []>} : vector<18x128xbf16>, vector<128x32xbf16>, vector<18x32xf32> -> vector<18x32xf32>
    %83 = arith.truncf %82 : vector<18x32xf32> to vector<18x32xbf16>
    %c9_73 = arith.constant 9 : index
    %c0_74 = arith.constant 0 : index
    %c0_75 = arith.constant 0 : index
    %84 = vector.load %arg5[%c9_73, %c0_74, %c0_75] : memref<16x32x64xbf16, #tpu.memory_space<vmem>>, vector<1x32x64xbf16>
    %85 = vector.shape_cast %84 : vector<1x32x64xbf16> to vector<32x64xbf16>
    %cst_76 = arith.constant dense<0.000000e+00> : vector<18x64xf32>
    %86 = tpu.matmul %83, %85, %cst_76 {dimension_numbers = #tpu.dot_dimension_numbers<[1], [0], [0], [1], [0, 0, 1, 1], [], []>} : vector<18x32xbf16>, vector<32x64xbf16>, vector<18x64xf32> -> vector<18x64xf32>
    %87 = arith.addf %79, %86 : vector<18x64xf32>
    %c10 = arith.constant 10 : index
    %c0_77 = arith.constant 0 : index
    %c0_78 = arith.constant 0 : index
    %88 = vector.load %arg4[%c10, %c0_77, %c0_78] : memref<16x18x128xbf16, #tpu.memory_space<vmem>>, vector<1x18x128xbf16>
    %89 = vector.shape_cast %88 : vector<1x18x128xbf16> to vector<18x128xbf16>
    %cst_79 = arith.constant dense<0.000000e+00> : vector<18x32xf32>
    %90 = tpu.matmul %89, %8, %cst_79 {dimension_numbers = #tpu.dot_dimension_numbers<[1], [0], [0], [1], [0, 0, 1, 1], [], []>} : vector<18x128xbf16>, vector<128x32xbf16>, vector<18x32xf32> -> vector<18x32xf32>
    %91 = arith.truncf %90 : vector<18x32xf32> to vector<18x32xbf16>
    %c10_80 = arith.constant 10 : index
    %c0_81 = arith.constant 0 : index
    %c0_82 = arith.constant 0 : index
    %92 = vector.load %arg5[%c10_80, %c0_81, %c0_82] : memref<16x32x64xbf16, #tpu.memory_space<vmem>>, vector<1x32x64xbf16>
    %93 = vector.shape_cast %92 : vector<1x32x64xbf16> to vector<32x64xbf16>
    %cst_83 = arith.constant dense<0.000000e+00> : vector<18x64xf32>
    %94 = tpu.matmul %91, %93, %cst_83 {dimension_numbers = #tpu.dot_dimension_numbers<[1], [0], [0], [1], [0, 0, 1, 1], [], []>} : vector<18x32xbf16>, vector<32x64xbf16>, vector<18x64xf32> -> vector<18x64xf32>
    %95 = arith.addf %87, %94 : vector<18x64xf32>
    %c11 = arith.constant 11 : index
    %c0_84 = arith.constant 0 : index
    %c0_85 = arith.constant 0 : index
    %96 = vector.load %arg4[%c11, %c0_84, %c0_85] : memref<16x18x128xbf16, #tpu.memory_space<vmem>>, vector<1x18x128xbf16>
    %97 = vector.shape_cast %96 : vector<1x18x128xbf16> to vector<18x128xbf16>
    %cst_86 = arith.constant dense<0.000000e+00> : vector<18x32xf32>
    %98 = tpu.matmul %97, %8, %cst_86 {dimension_numbers = #tpu.dot_dimension_numbers<[1], [0], [0], [1], [0, 0, 1, 1], [], []>} : vector<18x128xbf16>, vector<128x32xbf16>, vector<18x32xf32> -> vector<18x32xf32>
    %99 = arith.truncf %98 : vector<18x32xf32> to vector<18x32xbf16>
    %c11_87 = arith.constant 11 : index
    %c0_88 = arith.constant 0 : index
    %c0_89 = arith.constant 0 : index
    %100 = vector.load %arg5[%c11_87, %c0_88, %c0_89] : memref<16x32x64xbf16, #tpu.memory_space<vmem>>, vector<1x32x64xbf16>
    %101 = vector.shape_cast %100 : vector<1x32x64xbf16> to vector<32x64xbf16>
    %cst_90 = arith.constant dense<0.000000e+00> : vector<18x64xf32>
    %102 = tpu.matmul %99, %101, %cst_90 {dimension_numbers = #tpu.dot_dimension_numbers<[1], [0], [0], [1], [0, 0, 1, 1], [], []>} : vector<18x32xbf16>, vector<32x64xbf16>, vector<18x64xf32> -> vector<18x64xf32>
    %103 = arith.addf %95, %102 : vector<18x64xf32>
    %c12 = arith.constant 12 : index
    %c0_91 = arith.constant 0 : index
    %c0_92 = arith.constant 0 : index
    %104 = vector.load %arg4[%c12, %c0_91, %c0_92] : memref<16x18x128xbf16, #tpu.memory_space<vmem>>, vector<1x18x128xbf16>
    %105 = vector.shape_cast %104 : vector<1x18x128xbf16> to vector<18x128xbf16>
    %cst_93 = arith.constant dense<0.000000e+00> : vector<18x32xf32>
    %106 = tpu.matmul %105, %8, %cst_93 {dimension_numbers = #tpu.dot_dimension_numbers<[1], [0], [0], [1], [0, 0, 1, 1], [], []>} : vector<18x128xbf16>, vector<128x32xbf16>, vector<18x32xf32> -> vector<18x32xf32>
    %107 = arith.truncf %106 : vector<18x32xf32> to vector<18x32xbf16>
    %c12_94 = arith.constant 12 : index
    %c0_95 = arith.constant 0 : index
    %c0_96 = arith.constant 0 : index
    %108 = vector.load %arg5[%c12_94, %c0_95, %c0_96] : memref<16x32x64xbf16, #tpu.memory_space<vmem>>, vector<1x32x64xbf16>
    %109 = vector.shape_cast %108 : vector<1x32x64xbf16> to vector<32x64xbf16>
    %cst_97 = arith.constant dense<0.000000e+00> : vector<18x64xf32>
    %110 = tpu.matmul %107, %109, %cst_97 {dimension_numbers = #tpu.dot_dimension_numbers<[1], [0], [0], [1], [0, 0, 1, 1], [], []>} : vector<18x32xbf16>, vector<32x64xbf16>, vector<18x64xf32> -> vector<18x64xf32>
    %111 = arith.addf %103, %110 : vector<18x64xf32>
    %c13 = arith.constant 13 : index
    %c0_98 = arith.constant 0 : index
    %c0_99 = arith.constant 0 : index
    %112 = vector.load %arg4[%c13, %c0_98, %c0_99] : memref<16x18x128xbf16, #tpu.memory_space<vmem>>, vector<1x18x128xbf16>
    %113 = vector.shape_cast %112 : vector<1x18x128xbf16> to vector<18x128xbf16>
    %cst_100 = arith.constant dense<0.000000e+00> : vector<18x32xf32>
    %114 = tpu.matmul %113, %8, %cst_100 {dimension_numbers = #tpu.dot_dimension_numbers<[1], [0], [0], [1], [0, 0, 1, 1], [], []>} : vector<18x128xbf16>, vector<128x32xbf16>, vector<18x32xf32> -> vector<18x32xf32>
    %115 = arith.truncf %114 : vector<18x32xf32> to vector<18x32xbf16>
    %c13_101 = arith.constant 13 : index
    %c0_102 = arith.constant 0 : index
    %c0_103 = arith.constant 0 : index
    %116 = vector.load %arg5[%c13_101, %c0_102, %c0_103] : memref<16x32x64xbf16, #tpu.memory_space<vmem>>, vector<1x32x64xbf16>
    %117 = vector.shape_cast %116 : vector<1x32x64xbf16> to vector<32x64xbf16>
    %cst_104 = arith.constant dense<0.000000e+00> : vector<18x64xf32>
    %118 = tpu.matmul %115, %117, %cst_104 {dimension_numbers = #tpu.dot_dimension_numbers<[1], [0], [0], [1], [0, 0, 1, 1], [], []>} : vector<18x32xbf16>, vector<32x64xbf16>, vector<18x64xf32> -> vector<18x64xf32>
    %119 = arith.addf %111, %118 : vector<18x64xf32>
    %c14 = arith.constant 14 : index
    %c0_105 = arith.constant 0 : index
    %c0_106 = arith.constant 0 : index
    %120 = vector.load %arg4[%c14, %c0_105, %c0_106] : memref<16x18x128xbf16, #tpu.memory_space<vmem>>, vector<1x18x128xbf16>
    %121 = vector.shape_cast %120 : vector<1x18x128xbf16> to vector<18x128xbf16>
    %cst_107 = arith.constant dense<0.000000e+00> : vector<18x32xf32>
    %122 = tpu.matmul %121, %8, %cst_107 {dimension_numbers = #tpu.dot_dimension_numbers<[1], [0], [0], [1], [0, 0, 1, 1], [], []>} : vector<18x128xbf16>, vector<128x32xbf16>, vector<18x32xf32> -> vector<18x32xf32>
    %123 = arith.truncf %122 : vector<18x32xf32> to vector<18x32xbf16>
    %c14_108 = arith.constant 14 : index
    %c0_109 = arith.constant 0 : index
    %c0_110 = arith.constant 0 : index
    %124 = vector.load %arg5[%c14_108, %c0_109, %c0_110] : memref<16x32x64xbf16, #tpu.memory_space<vmem>>, vector<1x32x64xbf16>
    %125 = vector.shape_cast %124 : vector<1x32x64xbf16> to vector<32x64xbf16>
    %cst_111 = arith.constant dense<0.000000e+00> : vector<18x64xf32>
    %126 = tpu.matmul %123, %125, %cst_111 {dimension_numbers = #tpu.dot_dimension_numbers<[1], [0], [0], [1], [0, 0, 1, 1], [], []>} : vector<18x32xbf16>, vector<32x64xbf16>, vector<18x64xf32> -> vector<18x64xf32>
    %127 = arith.addf %119, %126 : vector<18x64xf32>
    %c15 = arith.constant 15 : index
    %c0_112 = arith.constant 0 : index
    %c0_113 = arith.constant 0 : index
    %128 = vector.load %arg4[%c15, %c0_112, %c0_113] : memref<16x18x128xbf16, #tpu.memory_space<vmem>>, vector<1x18x128xbf16>
    %129 = vector.shape_cast %128 : vector<1x18x128xbf16> to vector<18x128xbf16>
    %cst_114 = arith.constant dense<0.000000e+00> : vector<18x32xf32>
    %130 = tpu.matmul %129, %8, %cst_114 {dimension_numbers = #tpu.dot_dimension_numbers<[1], [0], [0], [1], [0, 0, 1, 1], [], []>} : vector<18x128xbf16>, vector<128x32xbf16>, vector<18x32xf32> -> vector<18x32xf32>
    %131 = arith.truncf %130 : vector<18x32xf32> to vector<18x32xbf16>
    %c15_115 = arith.constant 15 : index
    %c0_116 = arith.constant 0 : index
    %c0_117 = arith.constant 0 : index
    %132 = vector.load %arg5[%c15_115, %c0_116, %c0_117] : memref<16x32x64xbf16, #tpu.memory_space<vmem>>, vector<1x32x64xbf16>
    %133 = vector.shape_cast %132 : vector<1x32x64xbf16> to vector<32x64xbf16>
    %cst_118 = arith.constant dense<0.000000e+00> : vector<18x64xf32>
    %134 = tpu.matmul %131, %133, %cst_118 {dimension_numbers = #tpu.dot_dimension_numbers<[1], [0], [0], [1], [0, 0, 1, 1], [], []>} : vector<18x32xbf16>, vector<32x64xbf16>, vector<18x64xf32> -> vector<18x64xf32>
    %135 = arith.addf %127, %134 : vector<18x64xf32>
    %c0_119 = arith.constant 0 : index
    %c0_120 = arith.constant 0 : index
    %136 = vector.load %arg6[%c0_119, %c0_120] : memref<1x64xf32, #tpu.memory_space<vmem>>, vector<1x64xf32>
    %137 = vector.broadcast %136 : vector<1x64xf32> to vector<18x64xf32>
    %138 = arith.addf %135, %137 : vector<18x64xf32>
    %cst_121 = arith.constant 0.000000e+00 : f32
    %139 = vector.broadcast %cst_121 : f32 to vector<18x64xf32>
    %140 = arith.maximumf %138, %139 : vector<18x64xf32>
    %141 = arith.truncf %140 : vector<18x64xf32> to vector<18x64xbf16>
    %c0_122 = arith.constant 0 : index
    %c0_123 = arith.constant 0 : index
    %c0_124 = arith.constant 0 : index
    %142 = vector.load %arg7[%c0_122, %c0_123, %c0_124] : memref<9x2x18xbf16, #tpu.memory_space<vmem>>, vector<1x2x18xbf16>
    %143 = vector.shape_cast %142 : vector<1x2x18xbf16> to vector<2x18xbf16>
    %cst_125 = arith.constant dense<0.000000e+00> : vector<2x64xf32>
    %144 = tpu.matmul %143, %141, %cst_125 {dimension_numbers = #tpu.dot_dimension_numbers<[1], [0], [0], [1], [0, 0, 1, 1], [], []>} : vector<2x18xbf16>, vector<18x64xbf16>, vector<2x64xf32> -> vector<2x64xf32>
    %145 = arith.truncf %144 : vector<2x64xf32> to vector<2x64xbf16>
    %c0_126 = arith.constant 0 : index
    %c0_127 = arith.constant 0 : index
    %c0_128 = arith.constant 0 : index
    %146 = vector.load %arg8[%c0_126, %c0_127, %c0_128] : memref<9x64x64xbf16, #tpu.memory_space<vmem>>, vector<1x64x64xbf16>
    %147 = vector.shape_cast %146 : vector<1x64x64xbf16> to vector<64x64xbf16>
    %cst_129 = arith.constant dense<0.000000e+00> : vector<2x64xf32>
    %148 = tpu.matmul %145, %147, %cst_129 {dimension_numbers = #tpu.dot_dimension_numbers<[1], [0], [0], [1], [0, 0, 1, 1], [], []>} : vector<2x64xbf16>, vector<64x64xbf16>, vector<2x64xf32> -> vector<2x64xf32>
    %c1_130 = arith.constant 1 : index
    %c0_131 = arith.constant 0 : index
    %c0_132 = arith.constant 0 : index
    %149 = vector.load %arg7[%c1_130, %c0_131, %c0_132] : memref<9x2x18xbf16, #tpu.memory_space<vmem>>, vector<1x2x18xbf16>
    %150 = vector.shape_cast %149 : vector<1x2x18xbf16> to vector<2x18xbf16>
    %cst_133 = arith.constant dense<0.000000e+00> : vector<2x64xf32>
    %151 = tpu.matmul %150, %141, %cst_133 {dimension_numbers = #tpu.dot_dimension_numbers<[1], [0], [0], [1], [0, 0, 1, 1], [], []>} : vector<2x18xbf16>, vector<18x64xbf16>, vector<2x64xf32> -> vector<2x64xf32>
    %152 = arith.truncf %151 : vector<2x64xf32> to vector<2x64xbf16>
    %c1_134 = arith.constant 1 : index
    %c0_135 = arith.constant 0 : index
    %c0_136 = arith.constant 0 : index
    %153 = vector.load %arg8[%c1_134, %c0_135, %c0_136] : memref<9x64x64xbf16, #tpu.memory_space<vmem>>, vector<1x64x64xbf16>
    %154 = vector.shape_cast %153 : vector<1x64x64xbf16> to vector<64x64xbf16>
    %cst_137 = arith.constant dense<0.000000e+00> : vector<2x64xf32>
    %155 = tpu.matmul %152, %154, %cst_137 {dimension_numbers = #tpu.dot_dimension_numbers<[1], [0], [0], [1], [0, 0, 1, 1], [], []>} : vector<2x64xbf16>, vector<64x64xbf16>, vector<2x64xf32> -> vector<2x64xf32>
    %156 = arith.addf %148, %155 : vector<2x64xf32>
    %c2_138 = arith.constant 2 : index
    %c0_139 = arith.constant 0 : index
    %c0_140 = arith.constant 0 : index
    %157 = vector.load %arg7[%c2_138, %c0_139, %c0_140] : memref<9x2x18xbf16, #tpu.memory_space<vmem>>, vector<1x2x18xbf16>
    %158 = vector.shape_cast %157 : vector<1x2x18xbf16> to vector<2x18xbf16>
    %cst_141 = arith.constant dense<0.000000e+00> : vector<2x64xf32>
    %159 = tpu.matmul %158, %141, %cst_141 {dimension_numbers = #tpu.dot_dimension_numbers<[1], [0], [0], [1], [0, 0, 1, 1], [], []>} : vector<2x18xbf16>, vector<18x64xbf16>, vector<2x64xf32> -> vector<2x64xf32>
    %160 = arith.truncf %159 : vector<2x64xf32> to vector<2x64xbf16>
    %c2_142 = arith.constant 2 : index
    %c0_143 = arith.constant 0 : index
    %c0_144 = arith.constant 0 : index
    %161 = vector.load %arg8[%c2_142, %c0_143, %c0_144] : memref<9x64x64xbf16, #tpu.memory_space<vmem>>, vector<1x64x64xbf16>
    %162 = vector.shape_cast %161 : vector<1x64x64xbf16> to vector<64x64xbf16>
    %cst_145 = arith.constant dense<0.000000e+00> : vector<2x64xf32>
    %163 = tpu.matmul %160, %162, %cst_145 {dimension_numbers = #tpu.dot_dimension_numbers<[1], [0], [0], [1], [0, 0, 1, 1], [], []>} : vector<2x64xbf16>, vector<64x64xbf16>, vector<2x64xf32> -> vector<2x64xf32>
    %164 = arith.addf %156, %163 : vector<2x64xf32>
    %c3_146 = arith.constant 3 : index
    %c0_147 = arith.constant 0 : index
    %c0_148 = arith.constant 0 : index
    %165 = vector.load %arg7[%c3_146, %c0_147, %c0_148] : memref<9x2x18xbf16, #tpu.memory_space<vmem>>, vector<1x2x18xbf16>
    %166 = vector.shape_cast %165 : vector<1x2x18xbf16> to vector<2x18xbf16>
    %cst_149 = arith.constant dense<0.000000e+00> : vector<2x64xf32>
    %167 = tpu.matmul %166, %141, %cst_149 {dimension_numbers = #tpu.dot_dimension_numbers<[1], [0], [0], [1], [0, 0, 1, 1], [], []>} : vector<2x18xbf16>, vector<18x64xbf16>, vector<2x64xf32> -> vector<2x64xf32>
    %168 = arith.truncf %167 : vector<2x64xf32> to vector<2x64xbf16>
    %c3_150 = arith.constant 3 : index
    %c0_151 = arith.constant 0 : index
    %c0_152 = arith.constant 0 : index
    %169 = vector.load %arg8[%c3_150, %c0_151, %c0_152] : memref<9x64x64xbf16, #tpu.memory_space<vmem>>, vector<1x64x64xbf16>
    %170 = vector.shape_cast %169 : vector<1x64x64xbf16> to vector<64x64xbf16>
    %cst_153 = arith.constant dense<0.000000e+00> : vector<2x64xf32>
    %171 = tpu.matmul %168, %170, %cst_153 {dimension_numbers = #tpu.dot_dimension_numbers<[1], [0], [0], [1], [0, 0, 1, 1], [], []>} : vector<2x64xbf16>, vector<64x64xbf16>, vector<2x64xf32> -> vector<2x64xf32>
    %172 = arith.addf %164, %171 : vector<2x64xf32>
    %c4_154 = arith.constant 4 : index
    %c0_155 = arith.constant 0 : index
    %c0_156 = arith.constant 0 : index
    %173 = vector.load %arg7[%c4_154, %c0_155, %c0_156] : memref<9x2x18xbf16, #tpu.memory_space<vmem>>, vector<1x2x18xbf16>
    %174 = vector.shape_cast %173 : vector<1x2x18xbf16> to vector<2x18xbf16>
    %cst_157 = arith.constant dense<0.000000e+00> : vector<2x64xf32>
    %175 = tpu.matmul %174, %141, %cst_157 {dimension_numbers = #tpu.dot_dimension_numbers<[1], [0], [0], [1], [0, 0, 1, 1], [], []>} : vector<2x18xbf16>, vector<18x64xbf16>, vector<2x64xf32> -> vector<2x64xf32>
    %176 = arith.truncf %175 : vector<2x64xf32> to vector<2x64xbf16>
    %c4_158 = arith.constant 4 : index
    %c0_159 = arith.constant 0 : index
    %c0_160 = arith.constant 0 : index
    %177 = vector.load %arg8[%c4_158, %c0_159, %c0_160] : memref<9x64x64xbf16, #tpu.memory_space<vmem>>, vector<1x64x64xbf16>
    %178 = vector.shape_cast %177 : vector<1x64x64xbf16> to vector<64x64xbf16>
    %cst_161 = arith.constant dense<0.000000e+00> : vector<2x64xf32>
    %179 = tpu.matmul %176, %178, %cst_161 {dimension_numbers = #tpu.dot_dimension_numbers<[1], [0], [0], [1], [0, 0, 1, 1], [], []>} : vector<2x64xbf16>, vector<64x64xbf16>, vector<2x64xf32> -> vector<2x64xf32>
    %180 = arith.addf %172, %179 : vector<2x64xf32>
    %c5_162 = arith.constant 5 : index
    %c0_163 = arith.constant 0 : index
    %c0_164 = arith.constant 0 : index
    %181 = vector.load %arg7[%c5_162, %c0_163, %c0_164] : memref<9x2x18xbf16, #tpu.memory_space<vmem>>, vector<1x2x18xbf16>
    %182 = vector.shape_cast %181 : vector<1x2x18xbf16> to vector<2x18xbf16>
    %cst_165 = arith.constant dense<0.000000e+00> : vector<2x64xf32>
    %183 = tpu.matmul %182, %141, %cst_165 {dimension_numbers = #tpu.dot_dimension_numbers<[1], [0], [0], [1], [0, 0, 1, 1], [], []>} : vector<2x18xbf16>, vector<18x64xbf16>, vector<2x64xf32> -> vector<2x64xf32>
    %184 = arith.truncf %183 : vector<2x64xf32> to vector<2x64xbf16>
    %c5_166 = arith.constant 5 : index
    %c0_167 = arith.constant 0 : index
    %c0_168 = arith.constant 0 : index
    %185 = vector.load %arg8[%c5_166, %c0_167, %c0_168] : memref<9x64x64xbf16, #tpu.memory_space<vmem>>, vector<1x64x64xbf16>
    %186 = vector.shape_cast %185 : vector<1x64x64xbf16> to vector<64x64xbf16>
    %cst_169 = arith.constant dense<0.000000e+00> : vector<2x64xf32>
    %187 = tpu.matmul %184, %186, %cst_169 {dimension_numbers = #tpu.dot_dimension_numbers<[1], [0], [0], [1], [0, 0, 1, 1], [], []>} : vector<2x64xbf16>, vector<64x64xbf16>, vector<2x64xf32> -> vector<2x64xf32>
    %188 = arith.addf %180, %187 : vector<2x64xf32>
    %c6_170 = arith.constant 6 : index
    %c0_171 = arith.constant 0 : index
    %c0_172 = arith.constant 0 : index
    %189 = vector.load %arg7[%c6_170, %c0_171, %c0_172] : memref<9x2x18xbf16, #tpu.memory_space<vmem>>, vector<1x2x18xbf16>
    %190 = vector.shape_cast %189 : vector<1x2x18xbf16> to vector<2x18xbf16>
    %cst_173 = arith.constant dense<0.000000e+00> : vector<2x64xf32>
    %191 = tpu.matmul %190, %141, %cst_173 {dimension_numbers = #tpu.dot_dimension_numbers<[1], [0], [0], [1], [0, 0, 1, 1], [], []>} : vector<2x18xbf16>, vector<18x64xbf16>, vector<2x64xf32> -> vector<2x64xf32>
    %192 = arith.truncf %191 : vector<2x64xf32> to vector<2x64xbf16>
    %c6_174 = arith.constant 6 : index
    %c0_175 = arith.constant 0 : index
    %c0_176 = arith.constant 0 : index
    %193 = vector.load %arg8[%c6_174, %c0_175, %c0_176] : memref<9x64x64xbf16, #tpu.memory_space<vmem>>, vector<1x64x64xbf16>
    %194 = vector.shape_cast %193 : vector<1x64x64xbf16> to vector<64x64xbf16>
    %cst_177 = arith.constant dense<0.000000e+00> : vector<2x64xf32>
    %195 = tpu.matmul %192, %194, %cst_177 {dimension_numbers = #tpu.dot_dimension_numbers<[1], [0], [0], [1], [0, 0, 1, 1], [], []>} : vector<2x64xbf16>, vector<64x64xbf16>, vector<2x64xf32> -> vector<2x64xf32>
    %196 = arith.addf %188, %195 : vector<2x64xf32>
    %c7_178 = arith.constant 7 : index
    %c0_179 = arith.constant 0 : index
    %c0_180 = arith.constant 0 : index
    %197 = vector.load %arg7[%c7_178, %c0_179, %c0_180] : memref<9x2x18xbf16, #tpu.memory_space<vmem>>, vector<1x2x18xbf16>
    %198 = vector.shape_cast %197 : vector<1x2x18xbf16> to vector<2x18xbf16>
    %cst_181 = arith.constant dense<0.000000e+00> : vector<2x64xf32>
    %199 = tpu.matmul %198, %141, %cst_181 {dimension_numbers = #tpu.dot_dimension_numbers<[1], [0], [0], [1], [0, 0, 1, 1], [], []>} : vector<2x18xbf16>, vector<18x64xbf16>, vector<2x64xf32> -> vector<2x64xf32>
    %200 = arith.truncf %199 : vector<2x64xf32> to vector<2x64xbf16>
    %c7_182 = arith.constant 7 : index
    %c0_183 = arith.constant 0 : index
    %c0_184 = arith.constant 0 : index
    %201 = vector.load %arg8[%c7_182, %c0_183, %c0_184] : memref<9x64x64xbf16, #tpu.memory_space<vmem>>, vector<1x64x64xbf16>
    %202 = vector.shape_cast %201 : vector<1x64x64xbf16> to vector<64x64xbf16>
    %cst_185 = arith.constant dense<0.000000e+00> : vector<2x64xf32>
    %203 = tpu.matmul %200, %202, %cst_185 {dimension_numbers = #tpu.dot_dimension_numbers<[1], [0], [0], [1], [0, 0, 1, 1], [], []>} : vector<2x64xbf16>, vector<64x64xbf16>, vector<2x64xf32> -> vector<2x64xf32>
    %204 = arith.addf %196, %203 : vector<2x64xf32>
    %c8_186 = arith.constant 8 : index
    %c0_187 = arith.constant 0 : index
    %c0_188 = arith.constant 0 : index
    %205 = vector.load %arg7[%c8_186, %c0_187, %c0_188] : memref<9x2x18xbf16, #tpu.memory_space<vmem>>, vector<1x2x18xbf16>
    %206 = vector.shape_cast %205 : vector<1x2x18xbf16> to vector<2x18xbf16>
    %cst_189 = arith.constant dense<0.000000e+00> : vector<2x64xf32>
    %207 = tpu.matmul %206, %141, %cst_189 {dimension_numbers = #tpu.dot_dimension_numbers<[1], [0], [0], [1], [0, 0, 1, 1], [], []>} : vector<2x18xbf16>, vector<18x64xbf16>, vector<2x64xf32> -> vector<2x64xf32>
    %208 = arith.truncf %207 : vector<2x64xf32> to vector<2x64xbf16>
    %c8_190 = arith.constant 8 : index
    %c0_191 = arith.constant 0 : index
    %c0_192 = arith.constant 0 : index
    %209 = vector.load %arg8[%c8_190, %c0_191, %c0_192] : memref<9x64x64xbf16, #tpu.memory_space<vmem>>, vector<1x64x64xbf16>
    %210 = vector.shape_cast %209 : vector<1x64x64xbf16> to vector<64x64xbf16>
    %cst_193 = arith.constant dense<0.000000e+00> : vector<2x64xf32>
    %211 = tpu.matmul %208, %210, %cst_193 {dimension_numbers = #tpu.dot_dimension_numbers<[1], [0], [0], [1], [0, 0, 1, 1], [], []>} : vector<2x64xbf16>, vector<64x64xbf16>, vector<2x64xf32> -> vector<2x64xf32>
    %212 = arith.addf %204, %211 : vector<2x64xf32>
    %c0_194 = arith.constant 0 : index
    %c0_195 = arith.constant 0 : index
    %213 = vector.load %arg9[%c0_194, %c0_195] : memref<1x64xf32, #tpu.memory_space<vmem>>, vector<1x64xf32>
    %214 = vector.broadcast %213 : vector<1x64xf32> to vector<2x64xf32>
    %215 = arith.addf %212, %214 : vector<2x64xf32>
    %cst_196 = arith.constant 0.000000e+00 : f32
    %216 = vector.broadcast %cst_196 : f32 to vector<2x64xf32>
    %217 = arith.maximumf %215, %216 : vector<2x64xf32>
    %218 = arith.truncf %217 : vector<2x64xf32> to vector<2x64xbf16>
    %c0_197 = arith.constant 0 : index
    %c0_198 = arith.constant 0 : index
    %219 = vector.load %arg10[%c0_197, %c0_198] : memref<64x512xbf16, #tpu.memory_space<vmem>>, vector<64x512xbf16>
    %cst_199 = arith.constant dense<0.000000e+00> : vector<2x512xf32>
    %220 = tpu.matmul %218, %219, %cst_199 {dimension_numbers = #tpu.dot_dimension_numbers<[1], [0], [0], [1], [0, 0, 1, 1], [], []>} : vector<2x64xbf16>, vector<64x512xbf16>, vector<2x512xf32> -> vector<2x512xf32>
    %c0_200 = arith.constant 0 : index
    %c0_201 = arith.constant 0 : index
    %221 = vector.load %arg11[%c0_200, %c0_201] : memref<1x512xf32, #tpu.memory_space<vmem>>, vector<1x512xf32>
    %222 = vector.broadcast %221 : vector<1x512xf32> to vector<2x512xf32>
    %223 = arith.addf %220, %222 : vector<2x512xf32>
    %cst_202 = arith.constant 0.000000e+00 : f32
    %224 = vector.broadcast %cst_202 : f32 to vector<2x512xf32>
    %225 = arith.maximumf %223, %224 : vector<2x512xf32>
    %226 = arith.truncf %225 : vector<2x512xf32> to vector<2x512xbf16>
    %c0_203 = arith.constant 0 : index
    %c0_204 = arith.constant 0 : index
    %227 = vector.load %arg12[%c0_203, %c0_204] : memref<512x128xbf16, #tpu.memory_space<vmem>>, vector<512x128xbf16>
    %cst_205 = arith.constant dense<0.000000e+00> : vector<2x128xf32>
    %228 = tpu.matmul %226, %227, %cst_205 {dimension_numbers = #tpu.dot_dimension_numbers<[1], [0], [0], [1], [0, 0, 1, 1], [], []>} : vector<2x512xbf16>, vector<512x128xbf16>, vector<2x128xf32> -> vector<2x128xf32>
    %c0_206 = arith.constant 0 : index
    %c0_207 = arith.constant 0 : index
    %229 = vector.load %arg13[%c0_206, %c0_207] : memref<1x128xf32, #tpu.memory_space<vmem>>, vector<1x128xf32>
    %230 = vector.broadcast %229 : vector<1x128xf32> to vector<2x128xf32>
    %231 = arith.addf %228, %230 : vector<2x128xf32>
    %c0_208 = arith.constant 0 : index
    %c0_209 = arith.constant 0 : index
    %232 = vector.load %arg14[%c0_208, %c0_209] : memref<2x128xf32, #tpu.memory_space<vmem>>, vector<2x128xf32>
    tpu.vector_store %arg14[%c0_208, %c0_209], %231 {strides = array<i32>} : memref<2x128xf32, #tpu.memory_space<vmem>>, vector<2x128xf32>,
    return
  }
  func.func @transform_0(%arg0: i32) -> (i32, i32) {
    %c0_i32 = arith.constant 0 : i32
    %c0_i32_0 = arith.constant 0 : i32
    %c0_i32_1 = arith.constant 0 : i32
    return %c0_i32, %c0_i32_0 : i32, i32
  }
  func.func @transform_1(%arg0: i32) -> (i32, i32) {
    %c0_i32 = arith.constant 0 : i32
    %c0_i32_0 = arith.constant 0 : i32
    %c0_i32_1 = arith.constant 0 : i32
    return %c0_i32, %c0_i32_0 : i32, i32
  }
  func.func @transform_2(%arg0: i32) -> (i32, i32) {
    %c0_i32 = arith.constant 0 : i32
    %c0_i32_0 = arith.constant 0 : i32
    %c0_i32_1 = arith.constant 0 : i32
    return %c0_i32, %c0_i32_0 : i32, i32
  }
  func.func @transform_3(%arg0: i32) -> (i32, i32, i32) {
    %c0_i32 = arith.constant 0 : i32
    %c0_i32_0 = arith.constant 0 : i32
    %c0_i32_1 = arith.constant 0 : i32
    %c0_i32_2 = arith.constant 0 : i32
    return %c0_i32, %c0_i32_0, %c0_i32_1 : i32, i32, i32
  }
  func.func @transform_4(%arg0: i32) -> (i32, i32, i32) {
    %c0_i32 = arith.constant 0 : i32
    %c0_i32_0 = arith.constant 0 : i32
    %c0_i32_1 = arith.constant 0 : i32
    %c0_i32_2 = arith.constant 0 : i32
    return %c0_i32, %c0_i32_0, %c0_i32_1 : i32, i32, i32
  }
  func.func @transform_5(%arg0: i32) -> (i32, i32) {
    %c0_i32 = arith.constant 0 : i32
    %c0_i32_0 = arith.constant 0 : i32
    %c0_i32_1 = arith.constant 0 : i32
    return %c0_i32, %c0_i32_0 : i32, i32
  }
  func.func @transform_6(%arg0: i32) -> (i32, i32, i32) {
    %c0_i32 = arith.constant 0 : i32
    %c0_i32_0 = arith.constant 0 : i32
    %c0_i32_1 = arith.constant 0 : i32
    %c0_i32_2 = arith.constant 0 : i32
    return %c0_i32, %c0_i32_0, %c0_i32_1 : i32, i32, i32
  }
  func.func @transform_7(%arg0: i32) -> (i32, i32, i32) {
    %c0_i32 = arith.constant 0 : i32
    %c0_i32_0 = arith.constant 0 : i32
    %c0_i32_1 = arith.constant 0 : i32
    %c0_i32_2 = arith.constant 0 : i32
    return %c0_i32, %c0_i32_0, %c0_i32_1 : i32, i32, i32
  }
  func.func @transform_8(%arg0: i32) -> (i32, i32) {
    %c0_i32 = arith.constant 0 : i32
    %c0_i32_0 = arith.constant 0 : i32
    %c0_i32_1 = arith.constant 0 : i32
    return %c0_i32, %c0_i32_0 : i32, i32
  }
  func.func @transform_9(%arg0: i32) -> (i32, i32) {
    %c0_i32 = arith.constant 0 : i32
    %c0_i32_0 = arith.constant 0 : i32
    %c0_i32_1 = arith.constant 0 : i32
    return %c0_i32, %c0_i32_0 : i32, i32
  }
  func.func @transform_10(%arg0: i32) -> (i32, i32) {
    %c0_i32 = arith.constant 0 : i32
    %c0_i32_0 = arith.constant 0 : i32
    %c0_i32_1 = arith.constant 0 : i32
    return %c0_i32, %c0_i32_0 : i32, i32
  }
  func.func @transform_11(%arg0: i32) -> (i32, i32) {
    %c0_i32 = arith.constant 0 : i32
    %c0_i32_0 = arith.constant 0 : i32
    %c0_i32_1 = arith.constant 0 : i32
    return %c0_i32, %c0_i32_0 : i32, i32
  }
  func.func @transform_12(%arg0: i32) -> (i32, i32) {
    %c0_i32 = arith.constant 0 : i32
    %c0_i32_0 = arith.constant 0 : i32
    %c0_i32_1 = arith.constant 0 : i32
    return %c0_i32, %c0_i32_0 : i32, i32
  }
  func.func @transform_13(%arg0: i32) -> (i32, i32) {
    %c0_i32 = arith.constant 0 : i32
    %c0_i32_0 = arith.constant 0 : i32
    %c0_i32_1 = arith.constant 0 : i32
    return %c0_i32, %c0_i32_0 : i32, i32
  }
}

</mosaic_0001>

<bundles_post_ra>
// kernel: dqn_forward.1
= control target key start
LH: loop header
LB: loop body
LE: loop exit
PB: predicated region body
PF: predicated region fallthrough
CT: control target
= control target key end

     0   :  { %s7088_s0 = inlined_call_operand.vmem [shape: bf16[128,256], index: 0, kind: input, shape index: {}]   ;;  %s7089_s1 = inlined_call_operand.vmem [shape: bf16[256,32], index: 1, kind: input, shape index: {}]   ;;  %s7090_s2 = inlined_call_operand.vmem [shape: f32[1,32], index: 2, kind: input, shape index: {}]   ;;  %s7091_s3 = inlined_call_operand.vmem [shape: bf16[16,18,128], index: 3, kind: input, shape index: {}]   ;;  %s7092_s4 = inlined_call_operand.vmem [shape: bf16[16,32,64], index: 4, kind: input, shape index: {}]   ;;  %s7093_s5 = inlined_call_operand.vmem [shape: f32[1,64], index: 5, kind: input, shape index: {}]   ;;  %s7094_s6 = inlined_call_operand.vmem [shape: bf16[9,2,18], index: 6, kind: input, shape index: {}]   ;;  %s7095_s7 = inlined_call_operand.vmem [shape: bf16[9,64,64], index: 7, kind: input, shape index: {}]   ;;  %s7096_s8 = inlined_call_operand.vmem [shape: f32[1,64], index: 8, kind: input, shape index: {}]   ;;  %s7097_s9 = inlined_call_operand.vmem [shape: bf16[64,512], index: 9, kind: input, shape index: {}]   ;;  %s7098_s10 = inlined_call_operand.vmem [shape: f32[1,512], index: 10, kind: input, shape index: {}]   ;;  %s7099_s11 = inlined_call_operand.vmem [shape: bf16[512,128], index: 11, kind: input, shape index: {}]   ;;  %s7100_s12 = inlined_call_operand.vmem [shape: f32[1,128], index: 12, kind: input, shape index: {}]   ;;  %s7101_s13 = inlined_call_operand.hbm [shape: f32[2,128], index: 13, kind: output, shape index: {}]  }
   0x1   :  { %v5751_v0 = vld [vmem:[%s7089_s1 + $0x78] sm:$0xff]   ;;  %v5753_v2 = vld [vmem:[%s7089_s1 + $0x70] sm:$0xff]   ;;  %v5755_v4 = vld [vmem:[%s7089_s1 + $0x68] sm:$0xff]  }
   0x2   :  { %v5752_v1 = vld [vmem:[%s7089_s1 + $0x38] sm:$0xff]   ;;  %4715 = vmatprep.subr.bf16.mxu0 %v5751_v0  ;;  %v5754_v3 = vld [vmem:[%s7089_s1 + $0x30] sm:$0xff]   ;;  %v5756_v5 = vld [vmem:[%s7089_s1 + $0x28] sm:$0xff]  }
   0x3   :  { %4716 = vmatpush3.bf16.msra.mxu0 %v5752_v1  ;;  %v5757_v6 = vld [vmem:[%s7089_s1 + $0x60] sm:$0xff]   ;;  %v5759_v8 = vld [vmem:[%s7089_s1 + $0x58] sm:$0xff]   ;;  %v5761_v10 = vld [vmem:[%s7089_s1 + $0x50] sm:$0xff]  }
   0x4   :  { %4717 = vmatprep.subr.bf16.mxu0 %v5753_v2  ;;  %v5758_v7 = vld [vmem:[%s7089_s1 + $0x20] sm:$0xff]   ;;  %v5760_v9 = vld [vmem:[%s7089_s1 + $0x18] sm:$0xff]   ;;  %v5762_v12 = vld [vmem:[%s7089_s1 + $0x10] sm:$0xff]  }
   0x5   :  { %v5769_v11 = vld [vmem:[%s7088_s0 + $0x4] ss:$8 sps:$4 sm:$0xff]   ;;  %v5767_v17 = vld [vmem:[%s7088_s0] ss:$8 sps:$4 sm:$0xff]   ;;  %v5770_v18 = vld [vmem:[%s7088_s0 + $0x14] ss:$8 sps:$4 sm:$0xff]  }
   0x6   :  { %309 = vmatprep.mubr.bf16.mxu0 %v5769_v11  ;;  %v5763_v13 = vld [vmem:[%s7089_s1 + $0x48] sm:$0xff]   ;;  %v5765_v15 = vld [vmem:[%s7089_s1 + $0x40] sm:$0xff]   ;;  %v5772_v19 = vld [vmem:[%s7088_s0 + $0x10] ss:$8 sps:$4 sm:$0xff]  }
   0x7   :  { %4718 = vmatpush3.bf16.msra.mxu0 %v5754_v3  ;;  %v5764_v14 = vld [vmem:[%s7089_s1 + $0x8] sm:$0xff]   ;;  %v5766_v16 = vld [vmem:[%s7089_s1] sm:$0xff]   ;;  %v5776_v22 = vld [vmem:[%s7088_s0 + $0x34] ss:$8 sps:$4 sm:$0xff]  }
   0x8   :  { %4719 = vmatprep.subr.bf16.mxu0 %v5755_v4  ;;  %v5773_v20 = vld [vmem:[%s7088_s0 + $0x24] ss:$8 sps:$4 sm:$0xff]   ;;  %v5775_v21 = vld [vmem:[%s7088_s0 + $0x20] ss:$8 sps:$4 sm:$0xff]   ;;  %v5778_v23 = vld [vmem:[%s7088_s0 + $0x30] ss:$8 sps:$4 sm:$0xff]  }
   0x9   :  { %v5779_v24 = vld [vmem:[%s7088_s0 + $0x44] ss:$8 sps:$4 sm:$0xff]   ;;  %v5781_v25 = vld [vmem:[%s7088_s0 + $0x40] ss:$8 sps:$4 sm:$0xff]   ;;  %v5782_v26 = vld [vmem:[%s7088_s0 + $0x54] ss:$8 sps:$4 sm:$0xff]  }
   0xa   :  { %v5784_v27 = vld [vmem:[%s7088_s0 + $0x50] ss:$8 sps:$4 sm:$0xff]   ;;  %v5785_v28 = vld [vmem:[%s7088_s0 + $0x64] ss:$8 sps:$4 sm:$0xff]   ;;  %v5787_v29 = vld [vmem:[%s7088_s0 + $0x60] ss:$8 sps:$4 sm:$0xff]  }
   0xb   :  { %4720 = vmatpush3.bf16.msra.mxu0 %v5756_v5  ;;  %v5788_v30 = vld [vmem:[%s7088_s0 + $0x74] ss:$8 sps:$4 sm:$0xff]   ;;  %v5790_v31 = vld [vmem:[%s7088_s0 + $0x70] ss:$8 sps:$4 sm:$0xff]  }
   0xc   :  { %4721 = vmatprep.subr.bf16.mxu0 %v5757_v6 }
   0xf   :  { %4722 = vmatpush3.bf16.msra.mxu0 %v5758_v7 }
  0x10   :  { %4723 = vmatprep.subr.bf16.mxu0 %v5759_v8 }
  0x13   :  { %4724 = vmatpush3.bf16.msra.mxu0 %v5760_v9 }
  0x14   :  { %4725 = vmatprep.subr.bf16.mxu0 %v5761_v10 }
  0x17   :  { %4726 = vmatpush3.bf16.msra.mxu0 %v5762_v12 }
  0x18   :  { %4727 = vmatprep.subr.bf16.mxu0 %v5763_v13 }
  0x1b   :  { %4728 = vmatpush3.bf16.msra.mxu0 %v5764_v14 }
  0x1c   :  { %4729 = vmatprep.subr.bf16.mxu0 %v5765_v15 }
  0x1f   :  { %4730 = vmatpush3.bf16.msra.mxu0 %v5766_v16 }
  0x22   :  { %310 = vmatmul.mubr.bf16.vlgmr.msra.gmra.mxu0 %v5767_v17 }
  0x23   :  { %317 = vmatprep.mubr.bf16.mxu0 %v5770_v18 }
  0x2a   :  { %318 = vmatmul.mubr.bf16.gmra.mxu0 %v5772_v19 }
  0x2b   :  { %325 = vmatprep.mubr.bf16.mxu0 %v5773_v20 }
  0x32   :  { %326 = vmatmul.mubr.bf16.gmra.mxu0 %v5775_v21 }
  0x33   :  { %333 = vmatprep.mubr.bf16.mxu0 %v5776_v22 }
  0x3a   :  { %334 = vmatmul.mubr.bf16.gmra.mxu0 %v5778_v23 }
  0x3b   :  { %341 = vmatprep.mubr.bf16.mxu0 %v5779_v24 }
  0x42   :  { %342 = vmatmul.mubr.bf16.gmra.mxu0 %v5781_v25 }
  0x43   :  { %349 = vmatprep.mubr.bf16.mxu0 %v5782_v26 }
  0x4a   :  { %350 = vmatmul.mubr.bf16.gmra.mxu0 %v5784_v27 }
  0x4b   :  { %357 = vmatprep.mubr.bf16.mxu0 %v5785_v28 }
  0x52   :  { %358 = vmatmul.mubr.bf16.gmra.mxu0 %v5787_v29 }
  0x53   :  { %365 = vmatprep.mubr.bf16.mxu0 %v5788_v30 }
  0x5a   :  { %366 = vmatmul.mubr.bf16.gmra.mxu0 %v5790_v31 }
  0x5b   :  { %18 = vsyncpa [#allocation3], 0  ;;  %v5791_v32 = vld [vmem:[%s7091_s3] sm:$0xff]   ;;  %v5793_v33 = vld [vmem:[%s7091_s3 + $0x18] sm:$0xff]   ;;  %vm546_vm0 = vcmask 261120   ;;  %vm5970_vm1 = vmmov 0  }
  0x5c   :  { %5135 = vmatprep.mubr.bf16.mxu1 %v5791_v32  ;;  %5191 = vmatprep.mubr.bf16.mxu0 %v5793_v33  ;;  %v6148_v37 = vld [vmem:[%s7090_s2] ss:$0 sm:$0xff]  ;;  %vm2619_vm2 = vcmask 1040384   ;;  %vm2615_vm3 = vcmask 146432   ;;  %vm2751_vm4 = vcmask 523264  }
  0xe2   :  { %v4731_v34 = vpop.f32.mrf.mxu0 }
  0xe4   :  { %v4732_v35 = vpop.f32.mrf.mxu0 }
  0xe5   :  { %v4733_v36 = vadd.f32 %v4732_v35, %v4731_v34 }
  0xe6   :  { %v4734_v38 = vpop.f32.mrf.mxu0 }
  0xe7   :  { %v312_v40 = vadd.f32 %v4733_v36, %v6148_v37 }
  0xe8   :  { %v4735_v39 = vpop.f32.mrf.mxu0 }
  0xe9   :  { %v4736_v41 = vadd.f32 %v4735_v39, %v4734_v38  ;;  %v374_v45 = vmax.f32 %v312_v40, 0.0 }
  0xea   :  { %v4737_v42 = vpop.f32.mrf.mxu0 }
  0xeb   :  { %v315_v43 = vadd.f32 %v4736_v41, %v6148_v37 }
  0xec   :  { %v4738_v44 = vpop.f32.mrf.mxu0 }
  0xed   :  { %v375_v46 = vmax.f32 %v315_v43, 0.0  ;;  %v4739_v47 = vadd.f32 %v4738_v44, %v4737_v42 }
  0xee   :  { %v4740_v48 = vpop.f32.mrf.mxu0 }
  0xef   :  { %v6152_v49 = vpack.c.bf16 %v375_v46, %v374_v45  ;;  %v320_v51 = vadd.f32 %v4739_v47, %v6148_v37 }
  0xf0   :  { %v4741_v50 = vpop.f32.mrf.mxu0 }
  0xf1   :  { %v4742_v52 = vadd.f32 %v4741_v50, %v4740_v48  ;;  %v376_v56 = vmax.f32 %v320_v51, 0.0 }
  0xf2   :  { %v6155_v53 = vpop.f32.mrf.mxu0 }
  0xf3   :  { %v323_v54 = vadd.f32 %v4742_v52, %v6148_v37 }
  0xf4   :  { %v6158_v55 = vpop.f32.mrf.mxu0 }
  0xf5   :  { %v377_v57 = vmax.f32 %v323_v54, 0.0  ;;  %v4745_v48 = vadd.f32 %v6158_v55, %v6155_v53 }
  0xf6   :  { %v4746_v58 = vpop.f32.mrf.mxu0 }
  0xf7   :  { %v6160_v59 = vpack.c.bf16 %v377_v57, %v376_v56  ;;  %v328_v57 = vadd.f32 %v4745_v48, %v6148_v37 }
  0xf8   :  { %v4747_v60 = vpop.f32.mrf.mxu0 }
  0xf9   :  { %v4748_v44 = vadd.f32 %v4747_v60, %v4746_v58  ;;  %v378_v60 = vmax.f32 %v328_v57, 0.0 }
  0xfa   :  { %v4749_v61 = vpop.f32.mrf.mxu0 }
  0xfb   :  { %v331_v52 = vadd.f32 %v4748_v44, %v6148_v37 }
  0xfc   :  { %v4750_v62 = vpop.f32.mrf.mxu0 }
  0xfd   :  { %v4751_v41 = vadd.f32 %v4750_v62, %v4749_v61  ;;  %v379_v53 = vmax.f32 %v331_v52, 0.0  ;;  %v5792_v62 = vld [vmem:[%s7091_s3 + $0x8] ss:$0 sps:$4 sm:$0x11]  }
  0xfe   :  { %v4752_v63 = vpop.f32.mrf.mxu0 }
  0xff   :  { %v336_v50 = vadd.f32 %v4751_v41, %v6148_v37  ;;  %v6204_v61 = vpack.c.bf16 %v379_v53, %v378_v60 }
 0x100   :  { %v4753_v0 = vpop.f32.mrf.mxu0 }
 0x101   :  { %v4754_v36 = vadd.f32 %v4753_v0, %v4752_v63  ;;  %v380_v58 = vmax.f32 %v336_v50, 0.0  ;;  %v5795_v63 = vld [vmem:[%s7091_s3 + $0x20] ss:$0 sps:$4 sm:$0x11]   ;;  %v5796_v0 = vld [vmem:[%s7092_s4 + $0x30] sm:$0xff]  }
 0x102   :  { %v4755_v1 = vpop.f32.mrf.mxu0 }
 0x103   :  { %v339_v45 = vadd.f32 %v4754_v36, %v6148_v37 }
 0x104   :  { %v4756_v2 = vpop.f32.mrf.mxu0 }
 0x105   :  { %v4757_v32 = vadd.f32 %v4756_v2, %v4755_v1  ;;  %v381_v54 = vmax.f32 %v339_v45, 0.0  ;;  %v5797_v1 = vld [vmem:[%s7091_s3 + $0xc] sm:$0xff]   ;;  %v5798_v2 = vld [vmem:[%s7091_s3 + $0x14] ss:$0 sps:$4 sm:$0x11]  }
 0x106   :  { %v4758_v3 = vpop.f32.mrf.mxu0 }
 0x107   :  { %v344_v42 = vadd.f32 %v4757_v32, %v6148_v37  ;;  %v6198_v55 = vpack.c.bf16 %v381_v54, %v380_v58 }
 0x108   :  { %v4759_v4 = vpop.f32.mrf.mxu0 }
 0x109   :  { %v4760_v27 = vadd.f32 %v4759_v4, %v4758_v3  ;;  %v382_v51 = vmax.f32 %v344_v42, 0.0  ;;  %v5799_v3 = vld [vmem:[%s7092_s4 + $0x18] sm:$0xff]   ;;  %v5800_v4 = vld [vmem:[%s7092_s4 + $0x10] sm:$0xff]  }
 0x10a   :  { %v4761_v5 = vpop.f32.mrf.mxu0 }
 0x10b   :  { %v347_v38 = vadd.f32 %v4760_v27, %v6148_v37 }
 0x10c   :  { %v4762_v6 = vpop.f32.mrf.mxu0 }
 0x10d   :  { %v4763_v24 = vadd.f32 %v4762_v6, %v4761_v5  ;;  %v383_v46 = vmax.f32 %v347_v38, 0.0  ;;  %v5801_v5 = vld [vmem:[%s7092_s4 + $0x8] sm:$0xff]  }
 0x10e   :  { %v4764_v7 = vpop.f32.mrf.mxu0 }
 0x10f   :  { %v352_v33 = vadd.f32 %v4763_v24, %v6148_v37  ;;  %v6191_v56 = vpack.c.bf16 %v383_v46, %v382_v51 }
 0x110   :  { %v4765_v8 = vpop.f32.mrf.mxu0 }
 0x111   :  { %v4766_v20 = vadd.f32 %v4765_v8, %v4764_v7  ;;  %v384_v43 = vmax.f32 %v352_v33, 0.0 }
 0x112   :  { %v4767_v9 = vpop.f32.mrf.mxu0 }
 0x113   :  { %v355_v28 = vadd.f32 %v4766_v20, %v6148_v37 }
 0x114   :  { %v4768_v10 = vpop.f32.mrf.mxu0 }
 0x115   :  { %v4769_v18 = vadd.f32 %v4768_v10, %v4767_v9  ;;  %v385_v39 = vmax.f32 %v355_v28, 0.0  ;;  %v5807_v28 = vld [vmem:[%s7092_s4 + $0x48] sm:$0xff]  }
 0x116   :  { %v4770_v11 = vpop.f32.mrf.mxu0 }
 0x117   :  { %v360_v25 = vadd.f32 %v4769_v18, %v6148_v37  ;;  %v6181_v47 = vpack.c.bf16 %v385_v39, %v384_v43 }
 0x118   :  { %v4771_v12 = vpop.f32.mrf.mxu0 }
 0x119   :  { %v4772_v15 = vadd.f32 %v4771_v12, %v4770_v11  ;;  %v386_v34 = vmax.f32 %v360_v25, 0.0  ;;  %v5804_v25 = vld [vmem:[%s7092_s4 + $0x20] sm:$0xff]  }
 0x11a   :  { %v4773_v13 = vpop.f32.mrf.mxu0 }
 0x11b   :  { %v363_v21 = vadd.f32 %v4772_v15, %v6148_v37 }
 0x11c   :  { %v4774_v14 = vpop.f32.mrf.mxu0 }
 0x11d   :  { %v4775_v16 = vadd.f32 %v4774_v14, %v4773_v13  ;;  %v387_v29 = vmax.f32 %v363_v21, 0.0 }
 0x11e   :  { %v4776_v17 = vpop.f32.mrf.mxu0 }
 0x11f   :  { %v368_v22 = vadd.f32 %v4775_v16, %v6148_v37  ;;  %v6171_v40 = vpack.c.bf16 %v387_v29, %v386_v34  ;;  %v5806_v29 = vld [vmem:[%s7091_s3 + $0x2c] ss:$0 sps:$4 sm:$0x11]  }
 0x120   :  { %v4777_v19 = vpop.f32.mrf.mxu0 }
 0x121   :  { %v4778_v23 = vadd.f32 %v4777_v19, %v4776_v17  ;;  %v388_v30 = vmax.f32 %v368_v22, 0.0  ;;  %v5802_v19 = vld [vmem:[%s7092_s4] sm:$0xff]   ;;  %v5803_v22 = vld [vmem:[%s7092_s4 + $0x28] sm:$0xff]  }
 0x123   :  { %v371_v26 = vadd.f32 %v4778_v23, %v6148_v37  ;;  %v5794_v37 = vld [vmem:[%s7092_s4 + $0x38] sm:$0xff]  }
 0x125   :  { %v389_v31 = vmax.f32 %v371_v26, 0.0  ;;  %v5805_v26 = vld [vmem:[%s7091_s3 + $0x24] sm:$0xff]  }
 0x127   :  { %v6168_v35 = vpack.c.bf16 %v389_v31, %v388_v30  ;;  %v5808_v30 = vld [vmem:[%s7092_s4 + $0x40] sm:$0xff]  }
 0x129   :  { %5119 = vmatprep.subr.bf16.mxu1 %v6168_v35  ;;  %5175 = vmatprep.subr.bf16.mxu0 %v6168_v35 }
 0x12a   :  { %5120 = vmatpush3.bf16.msra.mxu1 %v6168_v35  ;;  %5176 = vmatpush3.bf16.msra.mxu0 %v6168_v35 }
 0x12b   :  { %5121 = vmatprep.subr.bf16.mxu1 %v6171_v40  ;;  %5177 = vmatprep.subr.bf16.mxu0 %v6171_v40 }
 0x12e   :  { %5122 = vmatpush3.bf16.msra.mxu1 %v6171_v40  ;;  %5178 = vmatpush3.bf16.msra.mxu0 %v6171_v40 }
 0x12f   :  { %5123 = vmatprep.subr.bf16.mxu1 %v6181_v47  ;;  %5179 = vmatprep.subr.bf16.mxu0 %v6181_v47 }
 0x132   :  { %5124 = vmatpush3.bf16.msra.mxu1 %v6181_v47  ;;  %5180 = vmatpush3.bf16.msra.mxu0 %v6181_v47 }
 0x133   :  { %5125 = vmatprep.subr.bf16.mxu1 %v6191_v56  ;;  %5181 = vmatprep.subr.bf16.mxu0 %v6191_v56 }
 0x136   :  { %5126 = vmatpush3.bf16.msra.mxu1 %v6191_v56  ;;  %5182 = vmatpush3.bf16.msra.mxu0 %v6191_v56 }
 0x137   :  { %5127 = vmatprep.subr.bf16.mxu1 %v6198_v55  ;;  %5183 = vmatprep.subr.bf16.mxu0 %v6198_v55 }
 0x13a   :  { %5128 = vmatpush3.bf16.msra.mxu1 %v6198_v55  ;;  %5184 = vmatpush3.bf16.msra.mxu0 %v6198_v55 }
 0x13b   :  { %5129 = vmatprep.subr.bf16.mxu1 %v6204_v61  ;;  %5185 = vmatprep.subr.bf16.mxu0 %v6204_v61 }
 0x13e   :  { %5130 = vmatpush3.bf16.msra.mxu1 %v6204_v61  ;;  %5186 = vmatpush3.bf16.msra.mxu0 %v6204_v61 }
 0x13f   :  { %5131 = vmatprep.subr.bf16.mxu1 %v6160_v59  ;;  %5187 = vmatprep.subr.bf16.mxu0 %v6160_v59 }
 0x142   :  { %5132 = vmatpush3.bf16.msra.mxu1 %v6160_v59  ;;  %5188 = vmatpush3.bf16.msra.mxu0 %v6160_v59 }
 0x143   :  { %5133 = vmatprep.subr.bf16.mxu1 %v6152_v49  ;;  %5189 = vmatprep.subr.bf16.mxu0 %v6152_v49 }
 0x146   :  { %5134 = vmatpush3.bf16.msra.mxu1 %v6152_v49  ;;  %5190 = vmatpush3.bf16.msra.mxu0 %v6152_v49 }
 0x147   :  { %5139 = vmatprep.subr.bf16.mxu1 %v6168_v35  ;;  %5223 = vmatprep.subr.bf16.mxu0 %v5794_v37 }
 0x149   :  { %5136 = vmatmul.mubr.bf16.vlgmr.msra.gmra.mxu1 %v5792_v62  ;;  %5192 = vmatmul.mubr.bf16.vlgmr.msra.gmra.mxu0 %v5795_v63  ;;  %v5809_v62 = vld [vmem:[%s7091_s3 + $0x30] sm:$0xff]  }
 0x14a   :  { %5140 = vmatpush3.bf16.msra.mxu1 %v6168_v35  ;;  %5224 = vmatpush3.bf16.msra.mxu0 %v5794_v37 }
 0x14b   :  { %5141 = vmatprep.subr.bf16.mxu1 %v6171_v40  ;;  %5225 = vmatprep.subr.bf16.mxu0 %v5796_v0 }
 0x14c   :  { %5155 = vmatprep.mubr.bf16.mxu1 %v5797_v1  ;;  %v5810_v1 = vld [vmem:[%s7091_s3 + $0x38] ss:$0 sps:$4 sm:$0x11]  }
 0x14e   :  { %5142 = vmatpush3.bf16.msra.mxu1 %v6171_v40  ;;  %5226 = vmatpush3.bf16.msra.mxu0 %v5796_v0  ;;  %v5811_v0 = vld [vmem:[%s7092_s4 + $0x58] sm:$0xff]  }
 0x14f   :  { %5143 = vmatprep.subr.bf16.mxu1 %v6181_v47  ;;  %5231 = vmatprep.subr.bf16.mxu0 %v6168_v35 }
 0x152   :  { %5144 = vmatpush3.bf16.msra.mxu1 %v6181_v47 }
 0x153   :  { %5145 = vmatprep.subr.bf16.mxu1 %v6191_v56 }
 0x156   :  { %5146 = vmatpush3.bf16.msra.mxu1 %v6191_v56 }
 0x157   :  { %5147 = vmatprep.subr.bf16.mxu1 %v6198_v55 }
 0x15a   :  { %5148 = vmatpush3.bf16.msra.mxu1 %v6198_v55 }
 0x15b   :  { %5149 = vmatprep.subr.bf16.mxu1 %v6204_v61 }
 0x15e   :  { %5150 = vmatpush3.bf16.msra.mxu1 %v6204_v61 }
 0x15f   :  { %5151 = vmatprep.subr.bf16.mxu1 %v6160_v59 }
 0x162   :  { %5152 = vmatpush3.bf16.msra.mxu1 %v6160_v59 }
 0x163   :  { %5153 = vmatprep.subr.bf16.mxu1 %v6152_v49 }
 0x166   :  { %5154 = vmatpush3.bf16.msra.mxu1 %v6152_v49 }
 0x167   :  { %5159 = vmatprep.subr.bf16.mxu1 %v5799_v3 }
 0x169   :  { %5156 = vmatmul.mubr.bf16.vlgmr.msra.gmra.mxu1 %v5798_v2  ;;  %v5812_v2 = vld [vmem:[%s7092_s4 + $0x50] sm:$0xff]  }
 0x16a   :  { %5160 = vmatpush3.bf16.msra.mxu1 %v5799_v3 }
 0x16b   :  { %5161 = vmatprep.subr.bf16.mxu1 %v5800_v4 }
 0x16e   :  { %5162 = vmatpush3.bf16.msra.mxu1 %v5800_v4 }
 0x16f   :  { %5167 = vmatprep.subr.bf16.mxu1 %v5801_v5 }
 0x209   :  { %v5137_v6 = vpop.f32.mrf.mxu1  ;;  %v5193_v7 = vpop.f32.mrf.mxu0 }
 0x20a   :  { %v460_v24 = vpack.c.bf16 %v5137_v6, %v5137_v6  ;;  %v730_v27 = vpack.c.bf16 %v5193_v7, %v5193_v7 }
 0x20b   :  { %v445_v8 = vpop.f32.mrf.mxu1  ;;  %v715_v9 = vpop.f32.mrf.mxu0 }
 0x20d   :  { %v5138_v10 = vpop.f32.mrf.mxu1  ;;  %v5194_v11 = vpop.f32.mrf.mxu0 }
 0x20f   :  { %v448_v12 = vpop.f32.mrf.mxu1  ;;  %v718_v21 = vpop.f32.mrf.mxu0 }
 0x210   :  { %v459_v20 = vpack.c.bf16 %v448_v12, %v445_v8  ;;  %v729_v23 = vpack.c.bf16 %v718_v21, %v715_v9 }
 0x229   :  { %v5157_v13 = vpop.f32.mrf.mxu1 }
 0x22a   :  { %v528_v18 = vpack.c.bf16 %v5157_v13, %v5157_v13 }
 0x22b   :  { %v513_v14 = vpop.f32.mrf.mxu1 }
 0x22d   :  { %v5158_v15 = vpop.f32.mrf.mxu1 }
 0x22e   :  { %v5813_v15 = vld [vmem:[%s7091_s3 + $0x3c] sm:$0xff]  }
 0x22f   :  { %v516_v16 = vpop.f32.mrf.mxu1 }
 0x230   :  { %v527_v17 = vpack.c.bf16 %v516_v16, %v513_v14 }
 0x232   :  { %5163 = vmatprep.mubr.msk.bf16.mxu1 %vm546_vm0, %v527_v17  ;;  %v5815_v17 = vld [vmem:[%s7092_s4 + $0x68] sm:$0xff]  }
 0x233   :  { %5164 = vmatmul.mubr.msk.bf16.vlgmr.msra.gmra.mxu1 %vm546_vm0, %v528_v18  ;;  %v5814_v18 = vld [vmem:[%s7091_s3 + $0x44] ss:$0 sps:$4 sm:$0x11]  }
 0x234   :  { %5168 = vmatpush3.bf16.msra.mxu1 %v5801_v5  ;;  %5171 = vmatprep.mubr.msk.bf16.mxu1 %vm546_vm0, %v459_v20 }
 0x235   :  { %5169 = vmatprep.subr.bf16.mxu1 %v5802_v19 }
 0x238   :  { %5170 = vmatpush3.bf16.msra.mxu1 %v5802_v19  ;;  %v5816_v19 = vld [vmem:[%s7092_s4 + $0x60] sm:$0xff]  }
 0x239   :  { %5195 = vmatprep.subr.bf16.mxu1 %v5803_v22 }
 0x23b   :  { %5172 = vmatmul.mubr.msk.bf16.vlgmr.msra.gmra.mxu1 %vm546_vm0, %v460_v24 }
 0x23c   :  { %5196 = vmatpush3.bf16.msra.mxu1 %v5803_v22  ;;  %5199 = vmatprep.mubr.msk.bf16.mxu1 %vm546_vm0, %v729_v23 }
 0x23d   :  { %5197 = vmatprep.subr.bf16.mxu1 %v5804_v25 }
 0x240   :  { %5198 = vmatpush3.bf16.msra.mxu1 %v5804_v25 }
 0x241   :  { %5203 = vmatprep.subr.bf16.mxu1 %v6168_v35 }
 0x243   :  { %5200 = vmatmul.mubr.msk.bf16.vlgmr.msra.gmra.mxu1 %vm546_vm0, %v730_v27 }
 0x244   :  { %5204 = vmatpush3.bf16.msra.mxu1 %v6168_v35  ;;  %5219 = vmatprep.mubr.bf16.mxu1 %v5805_v26 }
 0x245   :  { %5205 = vmatprep.subr.bf16.mxu1 %v6171_v40 }
 0x248   :  { %5206 = vmatpush3.bf16.msra.mxu1 %v6171_v40 }
 0x249   :  { %5207 = vmatprep.subr.bf16.mxu1 %v6181_v47 }
 0x24c   :  { %5208 = vmatpush3.bf16.msra.mxu1 %v6181_v47 }
 0x24d   :  { %5209 = vmatprep.subr.bf16.mxu1 %v6191_v56 }
 0x250   :  { %5210 = vmatpush3.bf16.msra.mxu1 %v6191_v56 }
 0x251   :  { %5211 = vmatprep.subr.bf16.mxu1 %v6198_v55 }
 0x254   :  { %5212 = vmatpush3.bf16.msra.mxu1 %v6198_v55 }
 0x255   :  { %5213 = vmatprep.subr.bf16.mxu1 %v6204_v61 }
 0x258   :  { %5214 = vmatpush3.bf16.msra.mxu1 %v6204_v61 }
 0x259   :  { %5215 = vmatprep.subr.bf16.mxu1 %v6160_v59 }
 0x25c   :  { %5216 = vmatpush3.bf16.msra.mxu1 %v6160_v59 }
 0x25d   :  { %5217 = vmatprep.subr.bf16.mxu1 %v6152_v49 }
 0x260   :  { %5218 = vmatpush3.bf16.msra.mxu1 %v6152_v49 }
 0x261   :  { %5251 = vmatprep.subr.bf16.mxu1 %v5807_v28 }
 0x263   :  { %5220 = vmatmul.mubr.bf16.vlgmr.msra.gmra.mxu1 %v5806_v29 }
 0x264   :  { %5252 = vmatpush3.bf16.msra.mxu1 %v5807_v28 }
 0x265   :  { %5253 = vmatprep.subr.bf16.mxu1 %v5808_v30 }
 0x268   :  { %5254 = vmatpush3.bf16.msra.mxu1 %v5808_v30 }
 0x269   :  { %5259 = vmatprep.subr.bf16.mxu1 %v6168_v35 }
 0x2f3   :  { %v5165_v31 = vpop.f32.mrf.mxu1 }
 0x2f5   :  { %v587_v32 = vpop.f32.mrf.mxu1 }
 0x2f7   :  { %v5166_v33 = vpop.f32.mrf.mxu1 }
 0x2f9   :  { %v590_v34 = vpop.f32.mrf.mxu1 }
 0x2fb   :  { %v5173_v36 = vpop.f32.mrf.mxu1 }
 0x2fc   :  { %v662_v38 = vadd.f32 %v5173_v36, %v5165_v31  ;;  %v5818_v36 = vld [vmem:[%s7091_s3 + $0x50] ss:$0 sps:$4 sm:$0x11]  }
 0x2fd   :  { %v653_v39 = vpop.f32.mrf.mxu1 }
 0x2fe   :  { %v654_v41 = vadd.f32 %v653_v39, %v587_v32  ;;  %v5817_v32 = vld [vmem:[%s7091_s3 + $0x48] sm:$0xff]  }
 0x2ff   :  { %v5174_v42 = vpop.f32.mrf.mxu1 }
 0x301   :  { %v656_v43 = vpop.f32.mrf.mxu1 }
 0x302   :  { %v657_v44 = vadd.f32 %v656_v43, %v590_v34  ;;  %v5819_v34 = vld [vmem:[%s7092_s4 + $0x78] sm:$0xff]  }
 0x303   :  { %v5201_v45 = vpop.f32.mrf.mxu1 }
 0x304   :  { %v804_v46 = vadd.f32 %v5201_v45, %v662_v38  ;;  %v5820_v38 = vld [vmem:[%s7092_s4 + $0x70] sm:$0xff]  }
 0x305   :  { %v788_v48 = vpop.f32.mrf.mxu1 }
 0x306   :  { %v802_v50 = vadd.f32 %v788_v48, %v654_v41 }
 0x307   :  { %v5202_v51 = vpop.f32.mrf.mxu1 }
 0x309   :  { %v791_v52 = vpop.f32.mrf.mxu1 }
 0x30a   :  { %v803_v54 = vadd.f32 %v791_v52, %v657_v44 }
 0x323   :  { %v5221_v57 = vpop.f32.mrf.mxu1 }
 0x324   :  { %v868_v63 = vpack.c.bf16 %v5221_v57, %v5221_v57  ;;  %v5821_v57 = vld [vmem:[%s7091_s3 + $0x54] sm:$0xff]  }
 0x325   :  { %v853_v58 = vpop.f32.mrf.mxu1 }
 0x327   :  { %v5222_v53 = vpop.f32.mrf.mxu1 }
 0x328   :  { %v5823_v53 = vld [vmem:[%s7092_s4 + $0x88] sm:$0xff]  }
 0x329   :  { %v856_v60 = vpop.f32.mrf.mxu1 }
 0x32a   :  { %v867_v37 = vpack.c.bf16 %v856_v60, %v853_v58  ;;  %v5822_v60 = vld [vmem:[%s7091_s3 + $0x5c] ss:$0 sps:$4 sm:$0x11]  }
 0x32c   :  { %5227 = vmatprep.mubr.msk.bf16.mxu0 %vm546_vm0, %v867_v37  ;;  %v5824_v37 = vld [vmem:[%s7092_s4 + $0x80] sm:$0xff]  }
 0x32d   :  { %5228 = vmatmul.mubr.msk.bf16.vlgmr.msra.gmra.mxu0 %vm546_vm0, %v868_v63 }
 0x32e   :  { %5232 = vmatpush3.bf16.msra.mxu0 %v6168_v35  ;;  %5247 = vmatprep.mubr.bf16.mxu0 %v5809_v62 }
 0x32f   :  { %5233 = vmatprep.subr.bf16.mxu0 %v6171_v40 }
 0x332   :  { %5234 = vmatpush3.bf16.msra.mxu0 %v6171_v40 }
 0x333   :  { %5235 = vmatprep.subr.bf16.mxu0 %v6181_v47 }
 0x336   :  { %5236 = vmatpush3.bf16.msra.mxu0 %v6181_v47 }
 0x337   :  { %5237 = vmatprep.subr.bf16.mxu0 %v6191_v56 }
 0x33a   :  { %5238 = vmatpush3.bf16.msra.mxu0 %v6191_v56 }
 0x33b   :  { %5239 = vmatprep.subr.bf16.mxu0 %v6198_v55 }
 0x33e   :  { %5240 = vmatpush3.bf16.msra.mxu0 %v6198_v55 }
 0x33f   :  { %5241 = vmatprep.subr.bf16.mxu0 %v6204_v61 }
 0x342   :  { %5242 = vmatpush3.bf16.msra.mxu0 %v6204_v61 }
 0x343   :  { %5243 = vmatprep.subr.bf16.mxu0 %v6160_v59 }
 0x346   :  { %5244 = vmatpush3.bf16.msra.mxu0 %v6160_v59 }
 0x347   :  { %5245 = vmatprep.subr.bf16.mxu0 %v6152_v49 }
 0x34a   :  { %5246 = vmatpush3.bf16.msra.mxu0 %v6152_v49 }
 0x34b   :  { %5279 = vmatprep.subr.bf16.mxu0 %v5811_v0 }
 0x34d   :  { %5248 = vmatmul.mubr.bf16.vlgmr.msra.gmra.mxu0 %v5810_v1 }
 0x34e   :  { %5280 = vmatpush3.bf16.msra.mxu0 %v5811_v0 }
 0x34f   :  { %5281 = vmatprep.subr.bf16.mxu0 %v5812_v2 }
 0x352   :  { %5282 = vmatpush3.bf16.msra.mxu0 %v5812_v2 }
 0x353   :  { %5287 = vmatprep.subr.bf16.mxu0 %v6168_v35 }
 0x3ed   :  { %v5229_v3 = vpop.f32.mrf.mxu0 }
 0x3ee   :  { %v942_v4 = vadd.f32 %v5229_v3, %v804_v46 }
 0x3ef   :  { %v926_v5 = vpop.f32.mrf.mxu0 }
 0x3f0   :  { %v940_v6 = vadd.f32 %v926_v5, %v802_v50 }
 0x3f1   :  { %v5230_v7 = vpop.f32.mrf.mxu0 }
 0x3f3   :  { %v929_v8 = vpop.f32.mrf.mxu0 }
 0x3f4   :  { %v941_v9 = vadd.f32 %v929_v8, %v803_v54 }
 0x40d   :  { %v5249_v10 = vpop.f32.mrf.mxu0 }
 0x40e   :  { %v1006_v16 = vpack.c.bf16 %v5249_v10, %v5249_v10  ;;  %v5825_v10 = vld [vmem:[%s7091_s3 + $0x60] sm:$0xff]  }
 0x40f   :  { %v991_v11 = vpop.f32.mrf.mxu0 }
 0x411   :  { %v5250_v12 = vpop.f32.mrf.mxu0 }
 0x412   :  { %v5827_v12 = vld [vmem:[%s7092_s4 + $0x98] sm:$0xff]  }
 0x413   :  { %v994_v13 = vpop.f32.mrf.mxu0 }
 0x414   :  { %v1005_v14 = vpack.c.bf16 %v994_v13, %v991_v11  ;;  %v5826_v13 = vld [vmem:[%s7091_s3 + $0x68] ss:$0 sps:$4 sm:$0x11]  }
 0x416   :  { %5255 = vmatprep.mubr.msk.bf16.mxu1 %vm546_vm0, %v1005_v14  ;;  %v5828_v14 = vld [vmem:[%s7092_s4 + $0x90] sm:$0xff]  }
 0x417   :  { %5256 = vmatmul.mubr.msk.bf16.vlgmr.msra.gmra.mxu1 %vm546_vm0, %v1006_v16 }
 0x418   :  { %5260 = vmatpush3.bf16.msra.mxu1 %v6168_v35  ;;  %5275 = vmatprep.mubr.bf16.mxu1 %v5813_v15 }
 0x419   :  { %5261 = vmatprep.subr.bf16.mxu1 %v6171_v40 }
 0x41c   :  { %5262 = vmatpush3.bf16.msra.mxu1 %v6171_v40 }
 0x41d   :  { %5263 = vmatprep.subr.bf16.mxu1 %v6181_v47 }
 0x420   :  { %5264 = vmatpush3.bf16.msra.mxu1 %v6181_v47 }
 0x421   :  { %5265 = vmatprep.subr.bf16.mxu1 %v6191_v56 }
 0x424   :  { %5266 = vmatpush3.bf16.msra.mxu1 %v6191_v56 }
 0x425   :  { %5267 = vmatprep.subr.bf16.mxu1 %v6198_v55 }
 0x428   :  { %5268 = vmatpush3.bf16.msra.mxu1 %v6198_v55 }
 0x429   :  { %5269 = vmatprep.subr.bf16.mxu1 %v6204_v61 }
 0x42c   :  { %5270 = vmatpush3.bf16.msra.mxu1 %v6204_v61 }
 0x42d   :  { %5271 = vmatprep.subr.bf16.mxu1 %v6160_v59 }
 0x430   :  { %5272 = vmatpush3.bf16.msra.mxu1 %v6160_v59 }
 0x431   :  { %5273 = vmatprep.subr.bf16.mxu1 %v6152_v49 }
 0x434   :  { %5274 = vmatpush3.bf16.msra.mxu1 %v6152_v49 }
 0x435   :  { %5307 = vmatprep.subr.bf16.mxu1 %v5815_v17 }
 0x437   :  { %5276 = vmatmul.mubr.bf16.vlgmr.msra.gmra.mxu1 %v5814_v18 }
 0x438   :  { %5308 = vmatpush3.bf16.msra.mxu1 %v5815_v17 }
 0x439   :  { %5309 = vmatprep.subr.bf16.mxu1 %v5816_v19 }
 0x43c   :  { %5310 = vmatpush3.bf16.msra.mxu1 %v5816_v19 }
 0x43d   :  { %5315 = vmatprep.subr.bf16.mxu1 %v6168_v35 }
 0x4d7   :  { %v5257_v20 = vpop.f32.mrf.mxu1 }
 0x4d8   :  { %v1080_v21 = vadd.f32 %v5257_v20, %v942_v4 }
 0x4d9   :  { %v1064_v22 = vpop.f32.mrf.mxu1 }
 0x4da   :  { %v1078_v23 = vadd.f32 %v1064_v22, %v940_v6 }
 0x4db   :  { %v5258_v24 = vpop.f32.mrf.mxu1 }
 0x4dd   :  { %v1067_v25 = vpop.f32.mrf.mxu1 }
 0x4de   :  { %v1079_v26 = vadd.f32 %v1067_v25, %v941_v9 }
 0x4f7   :  { %v5277_v27 = vpop.f32.mrf.mxu1 }
 0x4f8   :  { %v1144_v33 = vpack.c.bf16 %v5277_v27, %v5277_v27  ;;  %v5829_v27 = vld [vmem:[%s7091_s3 + $0x6c] sm:$0xff]  }
 0x4f9   :  { %v1129_v28 = vpop.f32.mrf.mxu1 }
 0x4fb   :  { %v5278_v29 = vpop.f32.mrf.mxu1 }
 0x4fc   :  { %v5831_v29 = vld [vmem:[%s7092_s4 + $0xa8] sm:$0xff]  }
 0x4fd   :  { %v1132_v30 = vpop.f32.mrf.mxu1 }
 0x4fe   :  { %v1143_v31 = vpack.c.bf16 %v1132_v30, %v1129_v28  ;;  %v5830_v30 = vld [vmem:[%s7091_s3 + $0x74] ss:$0 sps:$4 sm:$0x11]  }
 0x500   :  { %5283 = vmatprep.mubr.msk.bf16.mxu0 %vm546_vm0, %v1143_v31  ;;  %v5832_v31 = vld [vmem:[%s7092_s4 + $0xa0] sm:$0xff]  }
 0x501   :  { %5284 = vmatmul.mubr.msk.bf16.vlgmr.msra.gmra.mxu0 %vm546_vm0, %v1144_v33 }
 0x502   :  { %5288 = vmatpush3.bf16.msra.mxu0 %v6168_v35  ;;  %5303 = vmatprep.mubr.bf16.mxu0 %v5817_v32 }
 0x503   :  { %5289 = vmatprep.subr.bf16.mxu0 %v6171_v40 }
 0x506   :  { %5290 = vmatpush3.bf16.msra.mxu0 %v6171_v40 }
 0x507   :  { %5291 = vmatprep.subr.bf16.mxu0 %v6181_v47 }
 0x50a   :  { %5292 = vmatpush3.bf16.msra.mxu0 %v6181_v47 }
 0x50b   :  { %5293 = vmatprep.subr.bf16.mxu0 %v6191_v56 }
 0x50e   :  { %5294 = vmatpush3.bf16.msra.mxu0 %v6191_v56 }
 0x50f   :  { %5295 = vmatprep.subr.bf16.mxu0 %v6198_v55 }
 0x512   :  { %5296 = vmatpush3.bf16.msra.mxu0 %v6198_v55 }
 0x513   :  { %5297 = vmatprep.subr.bf16.mxu0 %v6204_v61 }
 0x516   :  { %5298 = vmatpush3.bf16.msra.mxu0 %v6204_v61 }
 0x517   :  { %5299 = vmatprep.subr.bf16.mxu0 %v6160_v59 }
 0x51a   :  { %5300 = vmatpush3.bf16.msra.mxu0 %v6160_v59 }
 0x51b   :  { %5301 = vmatprep.subr.bf16.mxu0 %v6152_v49 }
 0x51e   :  { %5302 = vmatpush3.bf16.msra.mxu0 %v6152_v49 }
 0x51f   :  { %5335 = vmatprep.subr.bf16.mxu0 %v5819_v34 }
 0x521   :  { %5304 = vmatmul.mubr.bf16.vlgmr.msra.gmra.mxu0 %v5818_v36 }
 0x522   :  { %5336 = vmatpush3.bf16.msra.mxu0 %v5819_v34 }
 0x523   :  { %5337 = vmatprep.subr.bf16.mxu0 %v5820_v38 }
 0x526   :  { %5338 = vmatpush3.bf16.msra.mxu0 %v5820_v38 }
 0x527   :  { %5343 = vmatprep.subr.bf16.mxu0 %v6168_v35 }
 0x5c1   :  { %v5285_v39 = vpop.f32.mrf.mxu0 }
 0x5c2   :  { %v1218_v41 = vadd.f32 %v5285_v39, %v1080_v21 }
 0x5c3   :  { %v1202_v42 = vpop.f32.mrf.mxu0 }
 0x5c4   :  { %v1216_v43 = vadd.f32 %v1202_v42, %v1078_v23 }
 0x5c5   :  { %v5286_v44 = vpop.f32.mrf.mxu0 }
 0x5c7   :  { %v1205_v45 = vpop.f32.mrf.mxu0 }
 0x5c8   :  { %v1217_v46 = vadd.f32 %v1205_v45, %v1079_v26 }
 0x5e1   :  { %v5305_v48 = vpop.f32.mrf.mxu0 }
 0x5e2   :  { %v1282_v58 = vpack.c.bf16 %v5305_v48, %v5305_v48  ;;  %v5833_v48 = vld [vmem:[%s7091_s3 + $0x78] sm:$0xff]  }
 0x5e3   :  { %v1267_v50 = vpop.f32.mrf.mxu0 }
 0x5e5   :  { %v5306_v51 = vpop.f32.mrf.mxu0 }
 0x5e6   :  { %v5835_v51 = vld [vmem:[%s7092_s4 + $0xb8] sm:$0xff]  }
 0x5e7   :  { %v1270_v52 = vpop.f32.mrf.mxu0 }
 0x5e8   :  { %v1281_v54 = vpack.c.bf16 %v1270_v52, %v1267_v50  ;;  %v5834_v52 = vld [vmem:[%s7091_s3 + $0x80] ss:$0 sps:$4 sm:$0x11]  }
 0x5ea   :  { %5311 = vmatprep.mubr.msk.bf16.mxu1 %vm546_vm0, %v1281_v54  ;;  %v5836_v54 = vld [vmem:[%s7092_s4 + $0xb0] sm:$0xff]  }
 0x5eb   :  { %5312 = vmatmul.mubr.msk.bf16.vlgmr.msra.gmra.mxu1 %vm546_vm0, %v1282_v58 }
 0x5ec   :  { %5316 = vmatpush3.bf16.msra.mxu1 %v6168_v35  ;;  %5331 = vmatprep.mubr.bf16.mxu1 %v5821_v57 }
 0x5ed   :  { %5317 = vmatprep.subr.bf16.mxu1 %v6171_v40 }
 0x5f0   :  { %5318 = vmatpush3.bf16.msra.mxu1 %v6171_v40 }
 0x5f1   :  { %5319 = vmatprep.subr.bf16.mxu1 %v6181_v47 }
 0x5f4   :  { %5320 = vmatpush3.bf16.msra.mxu1 %v6181_v47 }
 0x5f5   :  { %5321 = vmatprep.subr.bf16.mxu1 %v6191_v56 }
 0x5f8   :  { %5322 = vmatpush3.bf16.msra.mxu1 %v6191_v56 }
 0x5f9   :  { %5323 = vmatprep.subr.bf16.mxu1 %v6198_v55 }
 0x5fc   :  { %5324 = vmatpush3.bf16.msra.mxu1 %v6198_v55 }
 0x5fd   :  { %5325 = vmatprep.subr.bf16.mxu1 %v6204_v61 }
 0x600   :  { %5326 = vmatpush3.bf16.msra.mxu1 %v6204_v61 }
 0x601   :  { %5327 = vmatprep.subr.bf16.mxu1 %v6160_v59 }
 0x604   :  { %5328 = vmatpush3.bf16.msra.mxu1 %v6160_v59 }
 0x605   :  { %5329 = vmatprep.subr.bf16.mxu1 %v6152_v49 }
 0x608   :  { %5330 = vmatpush3.bf16.msra.mxu1 %v6152_v49 }
 0x609   :  { %5363 = vmatprep.subr.bf16.mxu1 %v5823_v53 }
 0x60b   :  { %5332 = vmatmul.mubr.bf16.vlgmr.msra.gmra.mxu1 %v5822_v60 }
 0x60c   :  { %5364 = vmatpush3.bf16.msra.mxu1 %v5823_v53 }
 0x60d   :  { %5365 = vmatprep.subr.bf16.mxu1 %v5824_v37 }
 0x610   :  { %5366 = vmatpush3.bf16.msra.mxu1 %v5824_v37 }
 0x611   :  { %5371 = vmatprep.subr.bf16.mxu1 %v6168_v35 }
 0x6ab   :  { %v5313_v62 = vpop.f32.mrf.mxu1 }
 0x6ac   :  { %v1356_v63 = vadd.f32 %v5313_v62, %v1218_v41 }
 0x6ad   :  { %v1340_v0 = vpop.f32.mrf.mxu1 }
 0x6ae   :  { %v1354_v1 = vadd.f32 %v1340_v0, %v1216_v43 }
 0x6af   :  { %v5314_v2 = vpop.f32.mrf.mxu1 }
 0x6b1   :  { %v1343_v3 = vpop.f32.mrf.mxu1 }
 0x6b2   :  { %v1355_v4 = vadd.f32 %v1343_v3, %v1217_v46 }
 0x6cb   :  { %v5333_v5 = vpop.f32.mrf.mxu1 }
 0x6cc   :  { %v1420_v11 = vpack.c.bf16 %v5333_v5, %v5333_v5  ;;  %v5837_v5 = vld [vmem:[%s7091_s3 + $0x84] sm:$0xff]  }
 0x6cd   :  { %v1405_v6 = vpop.f32.mrf.mxu1 }
 0x6cf   :  { %v5334_v7 = vpop.f32.mrf.mxu1 }
 0x6d0   :  { %v5839_v7 = vld [vmem:[%s7092_s4 + $0xc8] sm:$0xff]  }
 0x6d1   :  { %v1408_v8 = vpop.f32.mrf.mxu1 }
 0x6d2   :  { %v1419_v9 = vpack.c.bf16 %v1408_v8, %v1405_v6  ;;  %v5838_v8 = vld [vmem:[%s7091_s3 + $0x8c] ss:$0 sps:$4 sm:$0x11]  }
 0x6d4   :  { %5339 = vmatprep.mubr.msk.bf16.mxu0 %vm546_vm0, %v1419_v9  ;;  %v5840_v9 = vld [vmem:[%s7092_s4 + $0xc0] sm:$0xff]  }
 0x6d5   :  { %5340 = vmatmul.mubr.msk.bf16.vlgmr.msra.gmra.mxu0 %vm546_vm0, %v1420_v11 }
 0x6d6   :  { %5344 = vmatpush3.bf16.msra.mxu0 %v6168_v35  ;;  %5359 = vmatprep.mubr.bf16.mxu0 %v5825_v10 }
 0x6d7   :  { %5345 = vmatprep.subr.bf16.mxu0 %v6171_v40 }
 0x6da   :  { %5346 = vmatpush3.bf16.msra.mxu0 %v6171_v40 }
 0x6db   :  { %5347 = vmatprep.subr.bf16.mxu0 %v6181_v47 }
 0x6de   :  { %5348 = vmatpush3.bf16.msra.mxu0 %v6181_v47 }
 0x6df   :  { %5349 = vmatprep.subr.bf16.mxu0 %v6191_v56 }
 0x6e2   :  { %5350 = vmatpush3.bf16.msra.mxu0 %v6191_v56 }
 0x6e3   :  { %5351 = vmatprep.subr.bf16.mxu0 %v6198_v55 }
 0x6e6   :  { %5352 = vmatpush3.bf16.msra.mxu0 %v6198_v55 }
 0x6e7   :  { %5353 = vmatprep.subr.bf16.mxu0 %v6204_v61 }
 0x6ea   :  { %5354 = vmatpush3.bf16.msra.mxu0 %v6204_v61 }
 0x6eb   :  { %5355 = vmatprep.subr.bf16.mxu0 %v6160_v59 }
 0x6ee   :  { %5356 = vmatpush3.bf16.msra.mxu0 %v6160_v59 }
 0x6ef   :  { %5357 = vmatprep.subr.bf16.mxu0 %v6152_v49 }
 0x6f2   :  { %5358 = vmatpush3.bf16.msra.mxu0 %v6152_v49 }
 0x6f3   :  { %5391 = vmatprep.subr.bf16.mxu0 %v5827_v12 }
 0x6f5   :  { %5360 = vmatmul.mubr.bf16.vlgmr.msra.gmra.mxu0 %v5826_v13 }
 0x6f6   :  { %5392 = vmatpush3.bf16.msra.mxu0 %v5827_v12 }
 0x6f7   :  { %5393 = vmatprep.subr.bf16.mxu0 %v5828_v14 }
 0x6fa   :  { %5394 = vmatpush3.bf16.msra.mxu0 %v5828_v14 }
 0x6fb   :  { %5399 = vmatprep.subr.bf16.mxu0 %v6168_v35 }
 0x795   :  { %v5341_v15 = vpop.f32.mrf.mxu0 }
 0x796   :  { %v1494_v16 = vadd.f32 %v5341_v15, %v1356_v63 }
 0x797   :  { %v1478_v17 = vpop.f32.mrf.mxu0 }
 0x798   :  { %v1492_v18 = vadd.f32 %v1478_v17, %v1354_v1 }
 0x799   :  { %v5342_v19 = vpop.f32.mrf.mxu0 }
 0x79b   :  { %v1481_v20 = vpop.f32.mrf.mxu0 }
 0x79c   :  { %v1493_v21 = vadd.f32 %v1481_v20, %v1355_v4 }
 0x7b5   :  { %v5361_v22 = vpop.f32.mrf.mxu0 }
 0x7b6   :  { %v1558_v28 = vpack.c.bf16 %v5361_v22, %v5361_v22  ;;  %v5841_v22 = vld [vmem:[%s7091_s3 + $0x90] sm:$0xff]  }
 0x7b7   :  { %v1543_v23 = vpop.f32.mrf.mxu0 }
 0x7b9   :  { %v5362_v24 = vpop.f32.mrf.mxu0 }
 0x7ba   :  { %v5843_v24 = vld [vmem:[%s7092_s4 + $0xd8] sm:$0xff]  }
 0x7bb   :  { %v1546_v25 = vpop.f32.mrf.mxu0 }
 0x7bc   :  { %v1557_v26 = vpack.c.bf16 %v1546_v25, %v1543_v23  ;;  %v5842_v25 = vld [vmem:[%s7091_s3 + $0x98] ss:$0 sps:$4 sm:$0x11]  }
 0x7be   :  { %5367 = vmatprep.mubr.msk.bf16.mxu1 %vm546_vm0, %v1557_v26  ;;  %v5844_v26 = vld [vmem:[%s7092_s4 + $0xd0] sm:$0xff]  }
 0x7bf   :  { %5368 = vmatmul.mubr.msk.bf16.vlgmr.msra.gmra.mxu1 %vm546_vm0, %v1558_v28 }
 0x7c0   :  { %5372 = vmatpush3.bf16.msra.mxu1 %v6168_v35  ;;  %5387 = vmatprep.mubr.bf16.mxu1 %v5829_v27 }
 0x7c1   :  { %5373 = vmatprep.subr.bf16.mxu1 %v6171_v40 }
 0x7c4   :  { %5374 = vmatpush3.bf16.msra.mxu1 %v6171_v40 }
 0x7c5   :  { %5375 = vmatprep.subr.bf16.mxu1 %v6181_v47 }
 0x7c8   :  { %5376 = vmatpush3.bf16.msra.mxu1 %v6181_v47 }
 0x7c9   :  { %5377 = vmatprep.subr.bf16.mxu1 %v6191_v56 }
 0x7cc   :  { %5378 = vmatpush3.bf16.msra.mxu1 %v6191_v56 }
 0x7cd   :  { %5379 = vmatprep.subr.bf16.mxu1 %v6198_v55 }
 0x7d0   :  { %5380 = vmatpush3.bf16.msra.mxu1 %v6198_v55 }
 0x7d1   :  { %5381 = vmatprep.subr.bf16.mxu1 %v6204_v61 }
 0x7d4   :  { %5382 = vmatpush3.bf16.msra.mxu1 %v6204_v61 }
 0x7d5   :  { %5383 = vmatprep.subr.bf16.mxu1 %v6160_v59 }
 0x7d8   :  { %5384 = vmatpush3.bf16.msra.mxu1 %v6160_v59 }
 0x7d9   :  { %5385 = vmatprep.subr.bf16.mxu1 %v6152_v49 }
 0x7dc   :  { %5386 = vmatpush3.bf16.msra.mxu1 %v6152_v49 }
 0x7dd   :  { %5419 = vmatprep.subr.bf16.mxu1 %v5831_v29 }
 0x7df   :  { %5388 = vmatmul.mubr.bf16.vlgmr.msra.gmra.mxu1 %v5830_v30 }
 0x7e0   :  { %5420 = vmatpush3.bf16.msra.mxu1 %v5831_v29 }
 0x7e1   :  { %5421 = vmatprep.subr.bf16.mxu1 %v5832_v31 }
 0x7e4   :  { %5422 = vmatpush3.bf16.msra.mxu1 %v5832_v31 }
 0x7e5   :  { %5427 = vmatprep.subr.bf16.mxu1 %v6168_v35 }
 0x87f   :  { %v5369_v32 = vpop.f32.mrf.mxu1 }
 0x880   :  { %v1632_v33 = vadd.f32 %v5369_v32, %v1494_v16 }
 0x881   :  { %v1616_v34 = vpop.f32.mrf.mxu1 }
 0x882   :  { %v1630_v36 = vadd.f32 %v1616_v34, %v1492_v18 }
 0x883   :  { %v5370_v38 = vpop.f32.mrf.mxu1 }
 0x885   :  { %v1619_v39 = vpop.f32.mrf.mxu1 }
 0x886   :  { %v1631_v41 = vadd.f32 %v1619_v39, %v1493_v21 }
 0x89f   :  { %v5389_v42 = vpop.f32.mrf.mxu1 }
 0x8a0   :  { %v1696_v50 = vpack.c.bf16 %v5389_v42, %v5389_v42  ;;  %v5845_v42 = vld [vmem:[%s7091_s3 + $0x9c] sm:$0xff]  }
 0x8a1   :  { %v1681_v43 = vpop.f32.mrf.mxu1 }
 0x8a3   :  { %v5390_v44 = vpop.f32.mrf.mxu1 }
 0x8a4   :  { %v5847_v44 = vld [vmem:[%s7092_s4 + $0xe8] sm:$0xff]  }
 0x8a5   :  { %v1684_v45 = vpop.f32.mrf.mxu1 }
 0x8a6   :  { %v1695_v46 = vpack.c.bf16 %v1684_v45, %v1681_v43  ;;  %v5846_v45 = vld [vmem:[%s7091_s3 + $0xa4] ss:$0 sps:$4 sm:$0x11]  }
 0x8a8   :  { %5395 = vmatprep.mubr.msk.bf16.mxu0 %vm546_vm0, %v1695_v46  ;;  %v5848_v46 = vld [vmem:[%s7092_s4 + $0xe0] sm:$0xff]  }
 0x8a9   :  { %5396 = vmatmul.mubr.msk.bf16.vlgmr.msra.gmra.mxu0 %vm546_vm0, %v1696_v50 }
 0x8aa   :  { %5400 = vmatpush3.bf16.msra.mxu0 %v6168_v35  ;;  %5415 = vmatprep.mubr.bf16.mxu0 %v5833_v48 }
 0x8ab   :  { %5401 = vmatprep.subr.bf16.mxu0 %v6171_v40 }
 0x8ae   :  { %5402 = vmatpush3.bf16.msra.mxu0 %v6171_v40 }
 0x8af   :  { %5403 = vmatprep.subr.bf16.mxu0 %v6181_v47 }
 0x8b2   :  { %5404 = vmatpush3.bf16.msra.mxu0 %v6181_v47 }
 0x8b3   :  { %5405 = vmatprep.subr.bf16.mxu0 %v6191_v56 }
 0x8b6   :  { %5406 = vmatpush3.bf16.msra.mxu0 %v6191_v56 }
 0x8b7   :  { %5407 = vmatprep.subr.bf16.mxu0 %v6198_v55 }
 0x8ba   :  { %5408 = vmatpush3.bf16.msra.mxu0 %v6198_v55 }
 0x8bb   :  { %5409 = vmatprep.subr.bf16.mxu0 %v6204_v61 }
 0x8be   :  { %5410 = vmatpush3.bf16.msra.mxu0 %v6204_v61 }
 0x8bf   :  { %5411 = vmatprep.subr.bf16.mxu0 %v6160_v59 }
 0x8c2   :  { %5412 = vmatpush3.bf16.msra.mxu0 %v6160_v59 }
 0x8c3   :  { %5413 = vmatprep.subr.bf16.mxu0 %v6152_v49 }
 0x8c6   :  { %5414 = vmatpush3.bf16.msra.mxu0 %v6152_v49 }
 0x8c7   :  { %5447 = vmatprep.subr.bf16.mxu0 %v5835_v51 }
 0x8c9   :  { %5416 = vmatmul.mubr.bf16.vlgmr.msra.gmra.mxu0 %v5834_v52 }
 0x8ca   :  { %5448 = vmatpush3.bf16.msra.mxu0 %v5835_v51 }
 0x8cb   :  { %5449 = vmatprep.subr.bf16.mxu0 %v5836_v54 }
 0x8ce   :  { %5450 = vmatpush3.bf16.msra.mxu0 %v5836_v54 }
 0x8cf   :  { %5455 = vmatprep.subr.bf16.mxu0 %v6168_v35 }
 0x969   :  { %v5397_v57 = vpop.f32.mrf.mxu0 }
 0x96a   :  { %v1770_v58 = vadd.f32 %v5397_v57, %v1632_v33 }
 0x96b   :  { %v1754_v53 = vpop.f32.mrf.mxu0 }
 0x96c   :  { %v1768_v60 = vadd.f32 %v1754_v53, %v1630_v36 }
 0x96d   :  { %v5398_v37 = vpop.f32.mrf.mxu0 }
 0x96f   :  { %v1757_v62 = vpop.f32.mrf.mxu0 }
 0x970   :  { %v1769_v63 = vadd.f32 %v1757_v62, %v1631_v41 }
 0x989   :  { %v5417_v0 = vpop.f32.mrf.mxu0 }
 0x98a   :  { %v1834_v6 = vpack.c.bf16 %v5417_v0, %v5417_v0  ;;  %v5849_v0 = vld [vmem:[%s7091_s3 + $0xa8] sm:$0xff]  }
 0x98b   :  { %v1819_v1 = vpop.f32.mrf.mxu0 }
 0x98d   :  { %v5418_v2 = vpop.f32.mrf.mxu0 }
 0x98e   :  { %v5850_v2 = vld [vmem:[%s7091_s3 + $0xb0] ss:$0 sps:$4 sm:$0x11]  }
 0x98f   :  { %v1822_v3 = vpop.f32.mrf.mxu0 }
 0x990   :  { %v1833_v4 = vpack.c.bf16 %v1822_v3, %v1819_v1 }
 0x992   :  { %5423 = vmatprep.mubr.msk.bf16.mxu1 %vm546_vm0, %v1833_v4 }
 0x993   :  { %5424 = vmatmul.mubr.msk.bf16.vlgmr.msra.gmra.mxu1 %vm546_vm0, %v1834_v6 }
 0x994   :  { %5428 = vmatpush3.bf16.msra.mxu1 %v6168_v35  ;;  %5443 = vmatprep.mubr.bf16.mxu1 %v5837_v5 }
 0x995   :  { %5429 = vmatprep.subr.bf16.mxu1 %v6171_v40 }
 0x998   :  { %5430 = vmatpush3.bf16.msra.mxu1 %v6171_v40 }
 0x999   :  { %5431 = vmatprep.subr.bf16.mxu1 %v6181_v47 }
 0x99c   :  { %5432 = vmatpush3.bf16.msra.mxu1 %v6181_v47 }
 0x99d   :  { %5433 = vmatprep.subr.bf16.mxu1 %v6191_v56 }
 0x9a0   :  { %5434 = vmatpush3.bf16.msra.mxu1 %v6191_v56 }
 0x9a1   :  { %5435 = vmatprep.subr.bf16.mxu1 %v6198_v55 }
 0x9a4   :  { %5436 = vmatpush3.bf16.msra.mxu1 %v6198_v55 }
 0x9a5   :  { %5437 = vmatprep.subr.bf16.mxu1 %v6204_v61 }
 0x9a8   :  { %5438 = vmatpush3.bf16.msra.mxu1 %v6204_v61 }
 0x9a9   :  { %5439 = vmatprep.subr.bf16.mxu1 %v6160_v59 }
 0x9ac   :  { %5440 = vmatpush3.bf16.msra.mxu1 %v6160_v59 }
 0x9ad   :  { %5441 = vmatprep.subr.bf16.mxu1 %v6152_v49 }
 0x9b0   :  { %5442 = vmatpush3.bf16.msra.mxu1 %v6152_v49 }
 0x9b1   :  { %5475 = vmatprep.subr.bf16.mxu1 %v5839_v7 }
 0x9b3   :  { %5444 = vmatmul.mubr.bf16.vlgmr.msra.gmra.mxu1 %v5838_v8 }
 0x9b4   :  { %5476 = vmatpush3.bf16.msra.mxu1 %v5839_v7 }
 0x9b5   :  { %5477 = vmatprep.subr.bf16.mxu1 %v5840_v9 }
 0x9b8   :  { %5478 = vmatpush3.bf16.msra.mxu1 %v5840_v9 }
 0x9b9   :  { %5483 = vmatprep.subr.bf16.mxu1 %v6168_v35 }
 0xa53   :  { %v5425_v10 = vpop.f32.mrf.mxu1 }
 0xa54   :  { %v1908_v11 = vadd.f32 %v5425_v10, %v1770_v58 }
 0xa55   :  { %v1892_v12 = vpop.f32.mrf.mxu1 }
 0xa56   :  { %v1906_v13 = vadd.f32 %v1892_v12, %v1768_v60 }
 0xa57   :  { %v5426_v14 = vpop.f32.mrf.mxu1 }
 0xa59   :  { %v1895_v15 = vpop.f32.mrf.mxu1 }
 0xa5a   :  { %v1907_v16 = vadd.f32 %v1895_v15, %v1769_v63  ;;  %v5851_v15 = vld [vmem:[%s7091_s3 + $0xb4] sm:$0xff]  }
 0xa73   :  { %v5445_v17 = vpop.f32.mrf.mxu1 }
 0xa74   :  { %v1972_v23 = vpack.c.bf16 %v5445_v17, %v5445_v17 }
 0xa75   :  { %v1957_v18 = vpop.f32.mrf.mxu1 }
 0xa77   :  { %v5446_v19 = vpop.f32.mrf.mxu1 }
 0xa79   :  { %v1960_v20 = vpop.f32.mrf.mxu1 }
 0xa7a   :  { %v1971_v21 = vpack.c.bf16 %v1960_v20, %v1957_v18 }
 0xa7c   :  { %5451 = vmatprep.mubr.msk.bf16.mxu0 %vm546_vm0, %v1971_v21 }
 0xa7d   :  { %5452 = vmatmul.mubr.msk.bf16.vlgmr.msra.gmra.mxu0 %vm546_vm0, %v1972_v23 }
 0xa7e   :  { %5456 = vmatpush3.bf16.msra.mxu0 %v6168_v35  ;;  %5471 = vmatprep.mubr.bf16.mxu0 %v5841_v22 }
 0xa7f   :  { %5457 = vmatprep.subr.bf16.mxu0 %v6171_v40 }
 0xa82   :  { %5458 = vmatpush3.bf16.msra.mxu0 %v6171_v40 }
 0xa83   :  { %5459 = vmatprep.subr.bf16.mxu0 %v6181_v47 }
 0xa86   :  { %5460 = vmatpush3.bf16.msra.mxu0 %v6181_v47 }
 0xa87   :  { %5461 = vmatprep.subr.bf16.mxu0 %v6191_v56 }
 0xa8a   :  { %5462 = vmatpush3.bf16.msra.mxu0 %v6191_v56 }
 0xa8b   :  { %5463 = vmatprep.subr.bf16.mxu0 %v6198_v55 }
 0xa8e   :  { %5464 = vmatpush3.bf16.msra.mxu0 %v6198_v55 }
 0xa8f   :  { %5465 = vmatprep.subr.bf16.mxu0 %v6204_v61 }
 0xa92   :  { %5466 = vmatpush3.bf16.msra.mxu0 %v6204_v61 }
 0xa93   :  { %5467 = vmatprep.subr.bf16.mxu0 %v6160_v59 }
 0xa96   :  { %5468 = vmatpush3.bf16.msra.mxu0 %v6160_v59 }
 0xa97   :  { %5469 = vmatprep.subr.bf16.mxu0 %v6152_v49 }
 0xa9a   :  { %5470 = vmatpush3.bf16.msra.mxu0 %v6152_v49 }
 0xa9b   :  { %5503 = vmatprep.subr.bf16.mxu0 %v5843_v24 }
 0xa9d   :  { %5472 = vmatmul.mubr.bf16.vlgmr.msra.gmra.mxu0 %v5842_v25  ;;  %v5969_v25 = vmov 0.0  }
 0xa9e   :  { %5504 = vmatpush3.bf16.msra.mxu0 %v5843_v24 }
 0xa9f   :  { %5505 = vmatprep.subr.bf16.mxu0 %v5844_v26 }
 0xaa2   :  { %5506 = vmatpush3.bf16.msra.mxu0 %v5844_v26  ;;  %v5855_v26 = vld [vmem:[%s7095_s7 + $0x18] sm:$0xff]  }
 0xaa3   :  { %5511 = vmatprep.subr.bf16.mxu0 %v6168_v35 }
 0xb3d   :  { %v5453_v27 = vpop.f32.mrf.mxu0 }
 0xb3e   :  { %v2046_v28 = vadd.f32 %v5453_v27, %v1908_v11  ;;  %v5856_v27 = vld [vmem:[%s7095_s7 + $0x10] sm:$0xff]  }
 0xb3f   :  { %v2030_v29 = vpop.f32.mrf.mxu0 }
 0xb40   :  { %v2044_v30 = vadd.f32 %v2030_v29, %v1906_v13 }
 0xb41   :  { %v5454_v31 = vpop.f32.mrf.mxu0 }
 0xb43   :  { %v2033_v32 = vpop.f32.mrf.mxu0 }
 0xb44   :  { %v2045_v33 = vadd.f32 %v2033_v32, %v1907_v16 }
 0xb5d   :  { %v5473_v34 = vpop.f32.mrf.mxu0 }
 0xb5e   :  { %v2110_v43 = vpack.c.bf16 %v5473_v34, %v5473_v34 }
 0xb5f   :  { %v2095_v36 = vpop.f32.mrf.mxu0 }
 0xb61   :  { %v5474_v38 = vpop.f32.mrf.mxu0 }
 0xb63   :  { %v2098_v39 = vpop.f32.mrf.mxu0 }
 0xb64   :  { %v2109_v41 = vpack.c.bf16 %v2098_v39, %v2095_v36 }
 0xb66   :  { %5479 = vmatprep.mubr.msk.bf16.mxu1 %vm546_vm0, %v2109_v41 }
 0xb67   :  { %5480 = vmatmul.mubr.msk.bf16.vlgmr.msra.gmra.mxu1 %vm546_vm0, %v2110_v43 }
 0xb68   :  { %5484 = vmatpush3.bf16.msra.mxu1 %v6168_v35  ;;  %5499 = vmatprep.mubr.bf16.mxu1 %v5845_v42 }
 0xb69   :  { %5485 = vmatprep.subr.bf16.mxu1 %v6171_v40 }
 0xb6c   :  { %5486 = vmatpush3.bf16.msra.mxu1 %v6171_v40 }
 0xb6d   :  { %5487 = vmatprep.subr.bf16.mxu1 %v6181_v47 }
 0xb70   :  { %5488 = vmatpush3.bf16.msra.mxu1 %v6181_v47 }
 0xb71   :  { %5489 = vmatprep.subr.bf16.mxu1 %v6191_v56 }
 0xb74   :  { %5490 = vmatpush3.bf16.msra.mxu1 %v6191_v56 }
 0xb75   :  { %5491 = vmatprep.subr.bf16.mxu1 %v6198_v55 }
 0xb78   :  { %5492 = vmatpush3.bf16.msra.mxu1 %v6198_v55 }
 0xb79   :  { %5493 = vmatprep.subr.bf16.mxu1 %v6204_v61 }
 0xb7c   :  { %5494 = vmatpush3.bf16.msra.mxu1 %v6204_v61 }
 0xb7d   :  { %5495 = vmatprep.subr.bf16.mxu1 %v6160_v59 }
 0xb80   :  { %5496 = vmatpush3.bf16.msra.mxu1 %v6160_v59 }
 0xb81   :  { %5497 = vmatprep.subr.bf16.mxu1 %v6152_v49 }
 0xb84   :  { %5498 = vmatpush3.bf16.msra.mxu1 %v6152_v49 }
 0xb85   :  { %5531 = vmatprep.subr.bf16.mxu1 %v5847_v44 }
 0xb87   :  { %5500 = vmatmul.mubr.bf16.vlgmr.msra.gmra.mxu1 %v5846_v45 }
 0xb88   :  { %5532 = vmatpush3.bf16.msra.mxu1 %v5847_v44 }
 0xb89   :  { %5533 = vmatprep.subr.bf16.mxu1 %v5848_v46 }
 0xb8c   :  { %5534 = vmatpush3.bf16.msra.mxu1 %v5848_v46 }
 0xb8d   :  { %5539 = vmatprep.subr.bf16.mxu1 %v6168_v35 }
 0xc27   :  { %v5481_v48 = vpop.f32.mrf.mxu1 }
 0xc28   :  { %v2184_v50 = vadd.f32 %v5481_v48, %v2046_v28  ;;  %v5858_v28 = vld [vmem:[%s7095_s7 + $0x8] sm:$0xff]  }
 0xc29   :  { %v2168_v51 = vpop.f32.mrf.mxu1 }
 0xc2a   :  { %v2182_v52 = vadd.f32 %v2168_v51, %v2044_v30  ;;  %v4536_v30 = vld [vmem:[%s7093_s5] ss:$0 sm:$0xff] }
 0xc2b   :  { %v5482_v54 = vpop.f32.mrf.mxu1  ;;  %v2614_v51 = vld [vmem:[%s7094_s6] sm:$0x1] }
 0xc2c   :  { %v5857_v54 = vld [vmem:[%s7095_s7 + $0x38] sm:$0xff]  }
 0xc2d   :  { %v2171_v57 = vpop.f32.mrf.mxu1 }
 0xc2e   :  { %v2183_v58 = vadd.f32 %v2171_v57, %v2045_v33  ;;  %v5859_v57 = vld [vmem:[%s7095_s7 + $0x30] sm:$0xff]  }
 0xc47   :  { %v5501_v53 = vpop.f32.mrf.mxu1 }
 0xc48   :  { %v2248_v1 = vpack.c.bf16 %v5501_v53, %v5501_v53  ;;  %v5861_v53 = vld [vmem:[%s7095_s7 + $0x28] sm:$0xff]  }
 0xc49   :  { %v2233_v60 = vpop.f32.mrf.mxu1 }
 0xc4b   :  { %v5502_v37 = vpop.f32.mrf.mxu1 }
 0xc4d   :  { %v2236_v62 = vpop.f32.mrf.mxu1 }
 0xc4e   :  { %v2247_v63 = vpack.c.bf16 %v2236_v62, %v2233_v60  ;;  %v5862_v60 = vld [vmem:[%s7095_s7 + $0x20] sm:$0xff]  }
 0xc50   :  { %5507 = vmatprep.mubr.msk.bf16.mxu0 %vm546_vm0, %v2247_v63 }
 0xc51   :  { %5508 = vmatmul.mubr.msk.bf16.vlgmr.msra.gmra.mxu0 %vm546_vm0, %v2248_v1 }
 0xc52   :  { %5512 = vmatpush3.bf16.msra.mxu0 %v6168_v35  ;;  %5527 = vmatprep.mubr.bf16.mxu0 %v5849_v0 }
 0xc53   :  { %5513 = vmatprep.subr.bf16.mxu0 %v6171_v40 }
 0xc56   :  { %5514 = vmatpush3.bf16.msra.mxu0 %v6171_v40 }
 0xc57   :  { %5515 = vmatprep.subr.bf16.mxu0 %v6181_v47 }
 0xc5a   :  { %5516 = vmatpush3.bf16.msra.mxu0 %v6181_v47 }
 0xc5b   :  { %5517 = vmatprep.subr.bf16.mxu0 %v6191_v56 }
 0xc5e   :  { %5518 = vmatpush3.bf16.msra.mxu0 %v6191_v56 }
 0xc5f   :  { %5519 = vmatprep.subr.bf16.mxu0 %v6198_v55 }
 0xc62   :  { %5520 = vmatpush3.bf16.msra.mxu0 %v6198_v55 }
 0xc63   :  { %5521 = vmatprep.subr.bf16.mxu0 %v6204_v61 }
 0xc66   :  { %5522 = vmatpush3.bf16.msra.mxu0 %v6204_v61 }
 0xc67   :  { %5523 = vmatprep.subr.bf16.mxu0 %v6160_v59 }
 0xc6a   :  { %5524 = vmatpush3.bf16.msra.mxu0 %v6160_v59 }
 0xc6b   :  { %5525 = vmatprep.subr.bf16.mxu0 %v6152_v49 }
 0xc6e   :  { %5526 = vmatpush3.bf16.msra.mxu0 %v6152_v49 }
 0xc71   :  { %5528 = vmatmul.mubr.bf16.vlgmr.msra.gmra.mxu0 %v5850_v2 }
 0xd11   :  { %v5509_v3 = vpop.f32.mrf.mxu0 }
 0xd12   :  { %v2322_v4 = vadd.f32 %v5509_v3, %v2184_v50 }
 0xd13   :  { %v2306_v5 = vpop.f32.mrf.mxu0 }
 0xd14   :  { %v2320_v6 = vadd.f32 %v2306_v5, %v2182_v52  ;;  %v4538_v52 = vld [vmem:[%s7094_s6 + $0x1] sm:$0x1] }
 0xd15   :  { %v5510_v7 = vpop.f32.mrf.mxu0 }
 0xd16   :  { %v4558_v7 = vld [vmem:[%s7094_s6 + $0x2] sm:$0x1] }
 0xd17   :  { %v2309_v8 = vpop.f32.mrf.mxu0 }
 0xd18   :  { %v2321_v9 = vadd.f32 %v2309_v8, %v2183_v58  ;;  %v5860_v58 = vld [vmem:[%s7095_s7] sm:$0xff]  }
 0xd19   :  { %v4573_v8 = vld [vmem:[%s7094_s6 + $0x3] sm:$0x1] }
 0xd31   :  { %v5529_v10 = vpop.f32.mrf.mxu0 }
 0xd32   :  { %v2386_v16 = vpack.c.bf16 %v5529_v10, %v5529_v10  ;;  %v5864_v10 = vld [vmem:[%s7095_s7 + $0x50] sm:$0xff]  }
 0xd33   :  { %v2371_v11 = vpop.f32.mrf.mxu0 }
 0xd35   :  { %v5530_v12 = vpop.f32.mrf.mxu0 }
 0xd36   :  { %v5866_v12 = vld [vmem:[%s7095_s7 + $0x78] sm:$0xff]  }
 0xd37   :  { %v2374_v13 = vpop.f32.mrf.mxu0 }
 0xd38   :  { %v2385_v14 = vpack.c.bf16 %v2374_v13, %v2371_v11  ;;  %v5865_v11 = vld [vmem:[%s7095_s7 + $0x48] sm:$0xff]   ;;  %v5867_v13 = vld [vmem:[%s7095_s7 + $0x40] sm:$0xff]  }
 0xd3a   :  { %5535 = vmatprep.mubr.msk.bf16.mxu1 %vm546_vm0, %v2385_v14  ;;  %v5868_v14 = vld [vmem:[%s7095_s7 + $0x70] sm:$0xff]  }
 0xd3b   :  { %5536 = vmatmul.mubr.msk.bf16.vlgmr.msra.gmra.mxu1 %vm546_vm0, %v2386_v16  ;;  %v5870_v16 = vld [vmem:[%s7095_s7 + $0x60] sm:$0xff]  }
 0xd3c   :  { %5540 = vmatpush3.bf16.msra.mxu1 %v6168_v35  ;;  %5555 = vmatprep.mubr.bf16.mxu1 %v5851_v15  ;;  %v5852_v35 = vld [vmem:[%s7091_s3 + $0xbc] ss:$0 sps:$4 sm:$0x11]   ;;  %v5869_v15 = vld [vmem:[%s7095_s7 + $0x68] sm:$0xff]  }
 0xd3d   :  { %5541 = vmatprep.subr.bf16.mxu1 %v6171_v40 }
 0xd40   :  { %5542 = vmatpush3.bf16.msra.mxu1 %v6171_v40  ;;  %v5853_v40 = vld [vmem:[%s7092_s4 + $0xf8] sm:$0xff]  }
 0xd41   :  { %5543 = vmatprep.subr.bf16.mxu1 %v6181_v47  ;;  %5559 = vmatprep.subr.bf16.mxu0 %v5853_v40 }
 0xd42   :  { %5560 = vmatpush3.bf16.msra.mxu0 %v5853_v40 }
 0xd44   :  { %5544 = vmatpush3.bf16.msra.mxu1 %v6181_v47  ;;  %v5854_v47 = vld [vmem:[%s7092_s4 + $0xf0] sm:$0xff]  }
 0xd45   :  { %5545 = vmatprep.subr.bf16.mxu1 %v6191_v56  ;;  %5561 = vmatprep.subr.bf16.mxu0 %v5854_v47 }
 0xd46   :  { %5562 = vmatpush3.bf16.msra.mxu0 %v5854_v47 }
 0xd47   :  { %5567 = vmatprep.subr.bf16.mxu0 %v5969_v25 }
 0xd48   :  { %5546 = vmatpush3.bf16.msra.mxu1 %v6191_v56 }
 0xd49   :  { %5547 = vmatprep.subr.bf16.mxu1 %v6198_v55 }
 0xd4c   :  { %5548 = vmatpush3.bf16.msra.mxu1 %v6198_v55 }
 0xd4d   :  { %5549 = vmatprep.subr.bf16.mxu1 %v6204_v61 }
 0xd50   :  { %5550 = vmatpush3.bf16.msra.mxu1 %v6204_v61 }
 0xd51   :  { %5551 = vmatprep.subr.bf16.mxu1 %v6160_v59 }
 0xd54   :  { %5552 = vmatpush3.bf16.msra.mxu1 %v6160_v59 }
 0xd55   :  { %5553 = vmatprep.subr.bf16.mxu1 %v6152_v49 }
 0xd58   :  { %5554 = vmatpush3.bf16.msra.mxu1 %v6152_v49 }
 0xd59   :  { %5595 = vmatprep.subr.bf16.mxu1 %v5969_v25 }
 0xd5b   :  { %5556 = vmatmul.mubr.bf16.vlgmr.msra.gmra.mxu1 %v5852_v35 }
 0xd5c   :  { %5603 = vmatprep.mubr.msk.bf16.mxu1 %vm5970_vm1, %v5969_v25  ;;  %5596 = vmatpush3.bf16.msra.mxu1 %v5855_v26 }
 0xd5d   :  { %5597 = vmatprep.subr.bf16.mxu1 %v5969_v25 }
 0xd60   :  { %5598 = vmatpush3.bf16.msra.mxu1 %v5856_v27  ;;  %v5871_v27 = vld [vmem:[%s7095_s7 + $0x98] sm:$0xff]  }
 0xd61   :  { %5599 = vmatprep.subr.bf16.mxu1 %v5969_v25 }
 0xd64   :  { %5600 = vmatpush3.bf16.msra.mxu1 %v5858_v28 }
 0xd65   :  { %5601 = vmatprep.subr.bf16.mxu1 %v5969_v25 }
 0xd68   :  { %5602 = vmatpush3.bf16.msra.mxu1 %v5860_v58 }
 0xd69   :  { %5615 = vmatprep.subr.bf16.mxu1 %v5969_v25 }
 0xdfb   :  { %v5537_v59 = vpop.f32.mrf.mxu1 }
 0xdfc   :  { %v2460_v56 = vadd.f32 %v5537_v59, %v2322_v4 }
 0xdfd   :  { %v2444_v55 = vpop.f32.mrf.mxu1 }
 0xdfe   :  { %v2458_v61 = vadd.f32 %v2444_v55, %v2320_v6 }
 0xdff   :  { %v5538_v17 = vpop.f32.mrf.mxu1 }
 0xe01   :  { %v2447_v18 = vpop.f32.mrf.mxu1 }
 0xe02   :  { %v2459_v49 = vadd.f32 %v2447_v18, %v2321_v9  ;;  %v5863_v9 = vld [vmem:[%s7095_s7 + $0x58] sm:$0xff]  }
 0xe1b   :  { %v5557_v19 = vpop.f32.mrf.mxu1 }
 0xe1c   :  { %v2524_v24 = vpack.c.bf16 %v5557_v19, %v5557_v19 }
 0xe1d   :  { %v2509_v20 = vpop.f32.mrf.mxu1 }
 0xe1f   :  { %v5558_v21 = vpop.f32.mrf.mxu1 }
 0xe21   :  { %v2512_v22 = vpop.f32.mrf.mxu1 }
 0xe22   :  { %v2523_v23 = vpack.c.bf16 %v2512_v22, %v2509_v20 }
 0xe24   :  { %5563 = vmatprep.mubr.msk.bf16.mxu0 %vm546_vm0, %v2523_v23 }
 0xe25   :  { %5564 = vmatmul.mubr.msk.bf16.vlgmr.msra.gmra.mxu0 %vm546_vm0, %v2524_v24  ;;  %v4588_v24 = vld [vmem:[%s7094_s6 + $0x4] sm:$0x1] }
 0xe26   :  { %5571 = vmatprep.mubr.msk.bf16.mxu0 %vm5970_vm1, %v5969_v25 }
 0xee5   :  { %v5565_v29 = vpop.f32.mrf.mxu0 }
 0xee6   :  { %v2598_v31 = vadd.f32 %v5565_v29, %v2460_v56 }
 0xee7   :  { %v2582_v32 = vpop.f32.mrf.mxu0 }
 0xee8   :  { %v2608_v33 = vadd.f32 %v4536_v30, %v2598_v31  ;;  %v2596_v34 = vadd.f32 %v2582_v32, %v2458_v61  ;;  %v4603_v32 = vld [vmem:[%s7094_s6 + $0x5] sm:$0x1] }
 0xee9   :  { %v5566_v36 = vpop.f32.mrf.mxu0 }
 0xeea   :  { %v2611_v38 = vmax.f32 %v2608_v33, 0.0  ;;  %v2606_v42 = vadd.f32 %v4536_v30, %v2596_v34  ;;  %v5873_v33 = vld [vmem:[%s7095_s7 + $0x88] sm:$0xff]   ;;  %v5874_v34 = vld [vmem:[%s7095_s7 + $0xb8] sm:$0xff]   ;;  %v5875_v36 = vld [vmem:[%s7095_s7 + $0x80] sm:$0xff]  }
 0xeeb   :  { %v2585_v39 = vpop.f32.mrf.mxu0 }
 0xeec   :  { %v2613_v41 = vpack.c.bf16 %v2611_v38, %v2611_v38  ;;  %v2597_v43 = vadd.f32 %v2585_v39, %v2459_v49  ;;  %v2609_v46 = vmax.f32 %v2606_v42, 0.0  ;;  %v5876_v38 = vld [vmem:[%s7095_s7 + $0xb0] sm:$0xff]   ;;  %v5877_v39 = vld [vmem:[%s7095_s7 + $0xa8] sm:$0xff]  }
 0xeee   :  { %v6683_v44 = vsel %vm2619_vm2, %v2613_v41, 0  ;;  %v2607_v45 = vadd.f32 %v4536_v30, %v2597_v43  ;;  %v5872_v30 = vld [vmem:[%s7095_s7 + $0x90] sm:$0xff]   ;;  %v5878_v41 = vld [vmem:[%s7095_s7 + $0xa0] sm:$0xff]  }
 0xeef   :  { %5568 = vmatpush3.bf16.msra.mxu0 %v6683_v44 }
 0xef0   :  { %v2610_v48 = vmax.f32 %v2607_v45, 0.0  ;;  %5569 = vmatprep.subr.bf16.mxu0 %v5969_v25 }
 0xef2   :  { %v6687_v50 = vpack.c.bf16 %v2610_v48, %v2609_v46 }
 0xef4   :  { %5570 = vmatpush3.bf16.msra.mxu0 %v6687_v50 }
 0xef5   :  { %5575 = vmatprep.subr.bf16.mxu0 %v5969_v25 }
 0xef7   :  { %5572 = vmatmul.mubr.msk.bf16.vlgmr.msra.gmra.mxu0 %vm2615_vm3, %v2614_v51 }
 0xef8   :  { %5576 = vmatpush3.bf16.msra.mxu0 %v6683_v44  ;;  %5579 = vmatprep.mubr.msk.bf16.mxu0 %vm5970_vm1, %v5969_v25 }
 0xef9   :  { %5577 = vmatprep.subr.bf16.mxu0 %v5969_v25 }
 0xefc   :  { %5578 = vmatpush3.bf16.msra.mxu0 %v6687_v50 }
 0xefd   :  { %5583 = vmatprep.subr.bf16.mxu0 %v5969_v25 }
 0xeff   :  { %5580 = vmatmul.mubr.msk.bf16.vlgmr.msra.gmra.mxu0 %vm2615_vm3, %v4538_v52 }
 0xf00   :  { %5584 = vmatpush3.bf16.msra.mxu0 %v5857_v54  ;;  %5591 = vmatprep.mubr.msk.bf16.mxu0 %vm5970_vm1, %v5969_v25 }
 0xf01   :  { %5585 = vmatprep.subr.bf16.mxu0 %v5969_v25 }
 0xf04   :  { %5586 = vmatpush3.bf16.msra.mxu0 %v5859_v57 }
 0xf05   :  { %5587 = vmatprep.subr.bf16.mxu0 %v5969_v25 }
 0xf08   :  { %5588 = vmatpush3.bf16.msra.mxu0 %v5861_v53 }
 0xf09   :  { %5589 = vmatprep.subr.bf16.mxu0 %v5969_v25 }
 0xf0c   :  { %5590 = vmatpush3.bf16.msra.mxu0 %v5862_v60 }
 0xf0d   :  { %5607 = vmatprep.subr.bf16.mxu0 %v5969_v25 }
 0xfb7   :  { %v2657_v37 = vpop.f32.mrf.mxu0 }
 0xfb8   :  { %v2663_v62 = vpack.c.bf16 %v2657_v37, %v2657_v37 }
 0xfb9   :  { %v5573_v63 = vpop.f32.mrf.mxu0 }
 0xfba   :  { %5604 = vmatmul.mubr.msk.bf16.vlgmr.msra.gmra.mxu1 %vm2751_vm4, %v2663_v62 }
 0xfbb   :  { %v2660_v0 = vpop.f32.mrf.mxu0  ;;  %5623 = vmatprep.mubr.msk.bf16.mxu1 %vm5970_vm1, %v5969_v25  ;;  %5616 = vmatpush3.bf16.msra.mxu1 %v5863_v9  ;;  %v5881_v9 = vld [vmem:[%s7095_s7 + $0xc8] sm:$0xff]  }
 0xfbc   :  { %5617 = vmatprep.subr.bf16.mxu1 %v5969_v25 }
 0xfbd   :  { %v5574_v1 = vpop.f32.mrf.mxu0 }
 0xfbe   :  { %v4618_v1 = vld [vmem:[%s7094_s6 + $0x6] sm:$0x1] }
 0xfbf   :  { %v2711_v2 = vpop.f32.mrf.mxu0  ;;  %5618 = vmatpush3.bf16.msra.mxu1 %v5864_v10  ;;  %v5882_v10 = vld [vmem:[%s7095_s7 + $0xf8] sm:$0xff]  }
 0xfc0   :  { %v2717_v3 = vpack.c.bf16 %v2711_v2, %v2711_v2  ;;  %5619 = vmatprep.subr.bf16.mxu1 %v5969_v25 }
 0xfc1   :  { %v5581_v4 = vpop.f32.mrf.mxu0 }
 0xfc2   :  { %5592 = vmatmul.mubr.msk.bf16.vlgmr.msra.gmra.mxu0 %vm2751_vm4, %v2717_v3  ;;  %v5879_v3 = vld [vmem:[%s7095_s7 + $0xd8] sm:$0xff]  }
 0xfc3   :  { %5608 = vmatpush3.bf16.msra.mxu0 %v6683_v44  ;;  %v2714_v5 = vpop.f32.mrf.mxu0  ;;  %5611 = vmatprep.mubr.msk.bf16.mxu0 %vm5970_vm1, %v5969_v25 }
 0xfc4   :  { %5609 = vmatprep.subr.bf16.mxu0 %v5969_v25  ;;  %5620 = vmatpush3.bf16.msra.mxu1 %v5865_v11  ;;  %v5883_v11 = vld [vmem:[%s7095_s7 + $0xc0] sm:$0xff]  }
 0xfc5   :  { %v5582_v6 = vpop.f32.mrf.mxu0  ;;  %5621 = vmatprep.subr.bf16.mxu1 %v5969_v25 }
 0xfc6   :  { %v5880_v6 = vld [vmem:[%s7095_s7 + $0xd0] sm:$0xff]  }
 0xfc7   :  { %5610 = vmatpush3.bf16.msra.mxu0 %v6687_v50 }
 0xfc8   :  { %5627 = vmatprep.subr.bf16.mxu0 %v5969_v25  ;;  %5622 = vmatpush3.bf16.msra.mxu1 %v5867_v13  ;;  %v5885_v13 = vld [vmem:[%s7095_s7 + $0xe8] sm:$0xff]  }
 0xfc9   :  { %5647 = vmatprep.subr.bf16.mxu1 %v5969_v25 }
 0xfca   :  { %5612 = vmatmul.mubr.msk.bf16.vlgmr.msra.gmra.mxu0 %vm2615_vm3, %v4558_v7 }
 0xfcb   :  { %5628 = vmatpush3.bf16.msra.mxu0 %v6683_v44  ;;  %5631 = vmatprep.mubr.msk.bf16.mxu0 %vm5970_vm1, %v5969_v25 }
 0xfcc   :  { %5629 = vmatprep.subr.bf16.mxu0 %v5969_v25 }
 0xfcf   :  { %5630 = vmatpush3.bf16.msra.mxu0 %v6687_v50 }
 0xfd0   :  { %5635 = vmatprep.subr.bf16.mxu0 %v5969_v25 }
 0xfd2   :  { %5632 = vmatmul.mubr.msk.bf16.vlgmr.msra.gmra.mxu0 %vm2615_vm3, %v4573_v8  ;;  %v4633_v8 = vld [vmem:[%s7094_s6 + $0x7] sm:$0x1] }
 0xfd3   :  { %5643 = vmatprep.mubr.msk.bf16.mxu0 %vm5970_vm1, %v5969_v25  ;;  %5636 = vmatpush3.bf16.msra.mxu0 %v5866_v12  ;;  %v5884_v12 = vld [vmem:[%s7095_s7 + $0xf0] sm:$0xff]  }
 0xfd4   :  { %5637 = vmatprep.subr.bf16.mxu0 %v5969_v25 }
 0xfd7   :  { %5638 = vmatpush3.bf16.msra.mxu0 %v5868_v14  ;;  %v5886_v14 = vld [vmem:[%s7095_s7 + $0xe0] sm:$0xff]  }
 0xfd8   :  { %5639 = vmatprep.subr.bf16.mxu0 %v5969_v25 }
 0xfdb   :  { %5640 = vmatpush3.bf16.msra.mxu0 %v5869_v15 }
 0xfdc   :  { %5641 = vmatprep.subr.bf16.mxu0 %v5969_v25 }
 0xfdf   :  { %5642 = vmatpush3.bf16.msra.mxu0 %v5870_v16 }
 0xfe0   :  { %5667 = vmatprep.subr.bf16.mxu0 %v5969_v25 }
0x107a   :  { %v2856_v35 = vpop.f32.mrf.mxu1 }
0x107c   :  { %v5605_v40 = vpop.f32.mrf.mxu1 }
0x107e   :  { %v2859_v47 = vpop.f32.mrf.mxu1 }
0x1080   :  { %v5606_v59 = vpop.f32.mrf.mxu1 }
0x1082   :  { %v2789_v56 = vpop.f32.mrf.mxu0 }
0x1083   :  { %v2857_v55 = vadd.f32 %v2856_v35, %v2789_v56 }
0x1084   :  { %v5593_v61 = vpop.f32.mrf.mxu0 }
0x1086   :  { %v2792_v17 = vpop.f32.mrf.mxu0 }
0x1088   :  { %v5594_v18 = vpop.f32.mrf.mxu0 }
0x108a   :  { %v2901_v49 = vpop.f32.mrf.mxu0 }
0x108b   :  { %v2907_v19 = vpack.c.bf16 %v2901_v49, %v2901_v49 }
0x108c   :  { %v5613_v20 = vpop.f32.mrf.mxu0 }
0x108d   :  { %5624 = vmatmul.mubr.msk.bf16.vlgmr.msra.gmra.mxu1 %vm2751_vm4, %v2907_v19 }
0x108e   :  { %5648 = vmatpush3.bf16.msra.mxu1 %v6683_v44  ;;  %v2904_v21 = vpop.f32.mrf.mxu0  ;;  %5651 = vmatprep.mubr.msk.bf16.mxu1 %vm5970_vm1, %v5969_v25 }
0x108f   :  { %5649 = vmatprep.subr.bf16.mxu1 %v5969_v25 }
0x1090   :  { %v5614_v22 = vpop.f32.mrf.mxu0 }
0x1092   :  { %5650 = vmatpush3.bf16.msra.mxu1 %v6687_v50  ;;  %v3024_v23 = vpop.f32.mrf.mxu0 }
0x1093   :  { %v3030_v26 = vpack.c.bf16 %v3024_v23, %v3024_v23  ;;  %5655 = vmatprep.subr.bf16.mxu1 %v5969_v25  ;;  %v4648_v23 = vld [vmem:[%s7094_s6 + $0x8] sm:$0x1]  ;;  %s5972_s6 = smov [#allocation2]  }
0x1094   :  { %v5633_v28 = vpop.f32.mrf.mxu0  ;;  %s4294_s23 = sshll.u32 %s5972_s6, 4  ;;  %s4295_s23 = int_to_ptr.vmem [resolvable:$true] %s4294_s23 }
0x1095   :  { %5644 = vmatmul.mubr.msk.bf16.vlgmr.msra.gmra.mxu0 %vm2751_vm4, %v3030_v26  ;;  %5652 = vmatmul.mubr.msk.bf16.vlgmr.msra.gmra.mxu1 %vm2615_vm3, %v4588_v24  ;;  %v5888_v28 = vld [vmem:[%s7095_s7 + $0x110] sm:$0xff]   ;;  %s5947_s24 = scalar_lea.vmem %s4295_s23, 32  ;;  %p5952_p1 = scmp.lt.s32.totalorder %s4295_s23, %s4295_s23 }
0x1096   :  { %5668 = vmatpush3.bf16.msra.mxu0 %v6683_v44  ;;  %5671 = vmatprep.mubr.msk.bf16.mxu0 %vm5970_vm1, %v5969_v25  ;;  %v3027_v29 = vpop.f32.mrf.mxu0  ;;  %p5948_p0 = scmp.ne.s32.totalorder %s4295_s23, %s5947_s24  ;;  %p5953_p2 = scmp.lt.s32.totalorder %s5947_s24, %s5947_s24 }
0x1097   :  { %5669 = vmatprep.subr.bf16.mxu0 %v5969_v25  ;;  %5656 = vmatpush3.bf16.msra.mxu1 %v5871_v27  ;;  %v5889_v29 = vld [vmem:[%s7095_s7 + $0x108] sm:$0xff]  }
0x1098   :  { %5657 = vmatprep.subr.bf16.mxu1 %v5969_v25  ;;  %v5634_v31 = vpop.f32.mrf.mxu0  ;;  %5663 = vmatprep.mubr.msk.bf16.mxu1 %vm5970_vm1, %v5969_v25  ;;  %p5954_p3 = por %p5953_p2, %p5952_p1 }
0x1099   :  { %v5891_v31 = vld [vmem:[%s7097_s9 + $0x60] ss:$16 sps:$4 sm:$0xff]  }
0x109a   :  { %5670 = vmatpush3.bf16.msra.mxu0 %v6687_v50  ;;  %p5955_p4 = pnand %p5954_p3, %p5948_p0 }
0x109b   :  { %5658 = vmatpush3.bf16.msra.mxu1 %v5872_v30  ;;  %5675 = vmatprep.subr.bf16.mxu0 %v5969_v25  ;;  %v5890_v30 = vld [vmem:[%s7095_s7 + $0x100] sm:$0xff]  }
0x109c   :  { %5659 = vmatprep.subr.bf16.mxu1 %v5969_v25 }
0x109d   :  { %5672 = vmatmul.mubr.msk.bf16.vlgmr.msra.gmra.mxu0 %vm2615_vm3, %v4603_v32  ;;  %v5893_v32 = vld [vmem:[%s7097_s9 + $0x64] ss:$16 sps:$4 sm:$0xff]  }
0x109e   :  { %5683 = vmatprep.mubr.msk.bf16.mxu0 %vm5970_vm1, %v5969_v25  ;;  %5676 = vmatpush3.bf16.msra.mxu0 %v5874_v34  ;;  %v5897_v34 = vld [vmem:[%s7097_s9 + $0x40] ss:$16 sps:$4 sm:$0xff]  }
0x109f   :  { %5660 = vmatpush3.bf16.msra.mxu1 %v5873_v33  ;;  %5677 = vmatprep.subr.bf16.mxu0 %v5969_v25  ;;  %v5896_v33 = vld [vmem:[%s7097_s9 + $0x6c] ss:$16 sps:$4 sm:$0xff]  }
0x10a0   :  { %5661 = vmatprep.subr.bf16.mxu1 %v5969_v25 }
0x10a2   :  { %5678 = vmatpush3.bf16.msra.mxu0 %v5876_v38 }
0x10a3   :  { %5662 = vmatpush3.bf16.msra.mxu1 %v5875_v36  ;;  %5679 = vmatprep.subr.bf16.mxu0 %v5969_v25 }
0x10a4   :  { %5687 = vmatprep.subr.bf16.mxu1 %v5969_v25 }
0x10a6   :  { %5680 = vmatpush3.bf16.msra.mxu0 %v5877_v39 }
0x10a7   :  { %5681 = vmatprep.subr.bf16.mxu0 %v5969_v25 }
0x10aa   :  { %5682 = vmatpush3.bf16.msra.mxu0 %v5878_v41 }
0x10ab   :  { %5707 = vmatprep.subr.bf16.mxu0 %v5969_v25 }
0x114d   :  { %v2978_v42 = vpop.f32.mrf.mxu1 }
0x114e   :  { %v2984_v43 = vadd.f32 %v2978_v42, %v2857_v55 }
0x114f   :  { %v5625_v45 = vpop.f32.mrf.mxu1 }
0x1151   :  { %v2981_v46 = vpop.f32.mrf.mxu1 }
0x1152   :  { %v5894_v46 = vld [vmem:[%s7097_s9 + $0x68] ss:$16 sps:$4 sm:$0xff]  }
0x1153   :  { %v5626_v48 = vpop.f32.mrf.mxu1 }
0x1155   :  { %v3101_v51 = vpop.f32.mrf.mxu0  ;;  %v3147_v52 = vpop.f32.mrf.mxu1 }
0x1156   :  { %v3107_v54 = vadd.f32 %v3101_v51, %v2984_v43  ;;  %v3153_v57 = vpack.c.bf16 %v3147_v52, %v3147_v52  ;;  %v5902_v52 = vld [vmem:[%s7097_s9 + $0x4c] ss:$16 sps:$4 sm:$0xff]  }
0x1157   :  { %v5645_v58 = vpop.f32.mrf.mxu0  ;;  %v5653_v53 = vpop.f32.mrf.mxu1 }
0x1158   :  { %5664 = vmatmul.mubr.msk.bf16.vlgmr.msra.gmra.mxu1 %vm2751_vm4, %v3153_v57 }
0x1159   :  { %5688 = vmatpush3.bf16.msra.mxu1 %v6683_v44  ;;  %v3104_v60 = vpop.f32.mrf.mxu0  ;;  %v3150_v37 = vpop.f32.mrf.mxu1  ;;  %5691 = vmatprep.mubr.msk.bf16.mxu1 %vm5970_vm1, %v5969_v25 }
0x115a   :  { %5689 = vmatprep.subr.bf16.mxu1 %v5969_v25  ;;  %v5900_v60 = vld [vmem:[%s7097_s9 + $0x48] ss:$16 sps:$4 sm:$0xff]  }
0x115b   :  { %v5646_v62 = vpop.f32.mrf.mxu0  ;;  %v5654_v63 = vpop.f32.mrf.mxu1 }
0x115c   :  { %v5905_v63 = vld [vmem:[%s7097_s9 + $0x24] ss:$16 sps:$4 sm:$0xff]  }
0x115d   :  { %5690 = vmatpush3.bf16.msra.mxu1 %v6687_v50  ;;  %v3270_v0 = vpop.f32.mrf.mxu0 }
0x115e   :  { %v3276_v2 = vpack.c.bf16 %v3270_v0, %v3270_v0  ;;  %5695 = vmatprep.subr.bf16.mxu1 %v5969_v25  ;;  %v5908_v0 = vld [vmem:[%s7097_s9 + $0x2c] ss:$16 sps:$4 sm:$0xff]  }
0x115f   :  { %v5673_v4 = vpop.f32.mrf.mxu0 }
0x1160   :  { %5684 = vmatmul.mubr.msk.bf16.vlgmr.msra.gmra.mxu0 %vm2751_vm4, %v3276_v2  ;;  %5692 = vmatmul.mubr.msk.bf16.vlgmr.msra.gmra.mxu1 %vm2615_vm3, %v4618_v1  ;;  %v5903_v1 = vld [vmem:[%s7097_s9 + $0x20] ss:$16 sps:$4 sm:$0xff]   ;;  %v5906_v2 = vld [vmem:[%s7097_s9 + $0x28] ss:$16 sps:$4 sm:$0xff]   ;;  %v5914_v4 = vld [vmem:[%s7097_s9 + $0xc] ss:$16 sps:$4 sm:$0xff]  }
0x1161   :  { %5708 = vmatpush3.bf16.msra.mxu0 %v6683_v44  ;;  %5711 = vmatprep.mubr.msk.bf16.mxu0 %vm5970_vm1, %v5969_v25  ;;  %v3273_v5 = vpop.f32.mrf.mxu0 }
0x1162   :  { %5709 = vmatprep.subr.bf16.mxu0 %v5969_v25  ;;  %5696 = vmatpush3.bf16.msra.mxu1 %v5879_v3  ;;  %v5911_v3 = vld [vmem:[%s7097_s9 + $0x4] ss:$16 sps:$4 sm:$0xff]   ;;  %v5909_v5 = vld [vmem:[%s7097_s9] ss:$16 sps:$4 sm:$0xff]  }
0x1163   :  { %5697 = vmatprep.subr.bf16.mxu1 %v5969_v25  ;;  %v5674_v7 = vpop.f32.mrf.mxu0  ;;  %5703 = vmatprep.mubr.msk.bf16.mxu1 %vm5970_vm1, %v5969_v25 }
0x1164   :  { %v5971_v7 = vmov 0  }
0x1165   :  { %5710 = vmatpush3.bf16.msra.mxu0 %v6687_v50 }
0x1166   :  { %5698 = vmatpush3.bf16.msra.mxu1 %v5880_v6  ;;  %5715 = vmatprep.subr.bf16.mxu0 %v5969_v25  ;;  %v5912_v6 = vld [vmem:[%s7097_s9 + $0x8] ss:$16 sps:$4 sm:$0xff]  }
0x1167   :  { %5699 = vmatprep.subr.bf16.mxu1 %v5969_v25 }
0x1168   :  { %5712 = vmatmul.mubr.msk.bf16.vlgmr.msra.gmra.mxu0 %vm2615_vm3, %v4633_v8  ;;  %v5915_v8 = vld [vmem:[%s7099_s11 + $0x78] sm:$0xff]  }
0x1169   :  { %5723 = vmatprep.mubr.msk.bf16.mxu0 %vm5970_vm1, %v5969_v25  ;;  %5716 = vmatpush3.bf16.msra.mxu0 %v5882_v10 }
0x116a   :  { %5700 = vmatpush3.bf16.msra.mxu1 %v5881_v9  ;;  %5717 = vmatprep.subr.bf16.mxu0 %v5969_v25  ;;  %v5916_v9 = vld [vmem:[%s7099_s11 + $0xf8] sm:$0xff]  }
0x116b   :  { %5701 = vmatprep.subr.bf16.mxu1 %v5969_v25 }
0x116d   :  { %5718 = vmatpush3.bf16.msra.mxu0 %v5884_v12 }
0x116e   :  { %5702 = vmatpush3.bf16.msra.mxu1 %v5883_v11  ;;  %5719 = vmatprep.subr.bf16.mxu0 %v5969_v25  ;;  %v4663_v11 = vld [vmem:[%s7096_s8] ss:$0 sm:$0xff] }
0x116f   :  { %5727 = vmatprep.subr.bf16.mxu1 %v5969_v25 }
0x1171   :  { %5720 = vmatpush3.bf16.msra.mxu0 %v5885_v13 }
0x1172   :  { %5721 = vmatprep.subr.bf16.mxu0 %v5969_v25 }
0x1175   :  { %5722 = vmatpush3.bf16.msra.mxu0 %v5886_v14 }
0x1176   :  { %3862 = vmatprep.subr.bf16.mxu0 %v5893_v32  ;;  %v5939_v32 = vld [vmem:[%s7099_s11 + $0x48] sm:$0xff]  }
0x1218   :  { %v3224_v15 = vpop.f32.mrf.mxu1 }
0x1219   :  { %v3230_v16 = vadd.f32 %v3224_v15, %v3107_v54 }
0x121a   :  { %v5665_v35 = vpop.f32.mrf.mxu1 }
0x121c   :  { %v3227_v40 = vpop.f32.mrf.mxu1 }
0x121d   :  { %v5917_v40 = vld [vmem:[%s7099_s11 + $0x38] sm:$0xff]  }
0x121e   :  { %v5666_v47 = vpop.f32.mrf.mxu1 }
0x121f   :  { %v5918_v47 = vld [vmem:[%s7099_s11 + $0xb8] sm:$0xff]  }
0x1220   :  { %v3347_v59 = vpop.f32.mrf.mxu0  ;;  %v3393_v56 = vpop.f32.mrf.mxu1 }
0x1221   :  { %v3353_v55 = vadd.f32 %v3347_v59, %v3230_v16  ;;  %v3399_v61 = vpack.c.bf16 %v3393_v56, %v3393_v56  ;;  %v5919_v56 = vld [vmem:[%s7099_s11 + $0x70] sm:$0xff]  }
0x1222   :  { %v5685_v17 = vpop.f32.mrf.mxu0  ;;  %v5693_v18 = vpop.f32.mrf.mxu1 }
0x1223   :  { %5704 = vmatmul.mubr.msk.bf16.vlgmr.msra.gmra.mxu1 %vm2751_vm4, %v3399_v61  ;;  %v5921_v61 = vld [vmem:[%s7099_s11 + $0x30] sm:$0xff]   ;;  %v5923_v18 = vld [vmem:[%s7099_s11 + $0x68] sm:$0xff]  }
0x1224   :  { %5728 = vmatpush3.bf16.msra.mxu1 %v6683_v44  ;;  %v3350_v49 = vpop.f32.mrf.mxu0  ;;  %v3396_v19 = vpop.f32.mrf.mxu1  ;;  %5731 = vmatprep.mubr.msk.bf16.mxu1 %vm5970_vm1, %v5969_v25  ;;  %v5887_v44 = vld [vmem:[%s7095_s7 + $0x118] sm:$0xff]   ;;  %v5922_v17 = vld [vmem:[%s7099_s11 + $0xb0] sm:$0xff]  }
0x1225   :  { %5729 = vmatprep.subr.bf16.mxu1 %v5969_v25  ;;  %v5924_v49 = vld [vmem:[%s7099_s11 + $0xe8] sm:$0xff]  }
0x1226   :  { %v5686_v20 = vpop.f32.mrf.mxu0  ;;  %v5694_v21 = vpop.f32.mrf.mxu1  ;;  %v5925_v19 = vld [vmem:[%s7099_s11 + $0x28] sm:$0xff]  }
0x1227   :  { %v5926_v20 = vld [vmem:[%s7099_s11 + $0xa8] sm:$0xff]   ;;  %v5927_v21 = vld [vmem:[%s7099_s11 + $0x60] sm:$0xff]  }
0x1228   :  { %5730 = vmatpush3.bf16.msra.mxu1 %v6687_v50  ;;  %v3516_v22 = vpop.f32.mrf.mxu0 }
0x1229   :  { %v3522_v24 = vpack.c.bf16 %v3516_v22, %v3516_v22  ;;  %5735 = vmatprep.subr.bf16.mxu1 %v5969_v25  ;;  %v5928_v22 = vld [vmem:[%s7099_s11 + $0xe0] sm:$0xff]  }
0x122a   :  { %v5713_v26 = vpop.f32.mrf.mxu0 }
0x122b   :  { %5724 = vmatmul.mubr.msk.bf16.vlgmr.msra.gmra.mxu0 %vm2751_vm4, %v3522_v24  ;;  %5732 = vmatmul.mubr.msk.bf16.vlgmr.msra.gmra.mxu1 %vm2615_vm3, %v4648_v23  ;;  %v5929_v23 = vld [vmem:[%s7099_s11 + $0x20] sm:$0xff]   ;;  %v5931_v24 = vld [vmem:[%s7099_s11 + $0x58] sm:$0xff]  }
0x122c   :  { %5736 = vmatpush3.bf16.msra.mxu1 %v5887_v44  ;;  %v3519_v27 = vpop.f32.mrf.mxu0  ;;  %5743 = vmatprep.mubr.msk.bf16.mxu1 %vm5970_vm1, %v5969_v25  ;;  %v5930_v44 = vld [vmem:[%s7099_s11 + $0xa0] sm:$0xff]   ;;  %v5932_v26 = vld [vmem:[%s7099_s11 + $0xd8] sm:$0xff]  }
0x122d   :  { %5737 = vmatprep.subr.bf16.mxu1 %v5969_v25  ;;  %3863 = vmatpush1.bf16.msra.mxu0 %v5891_v31  ;;  %v5933_v27 = vld [vmem:[%s7099_s11 + $0x18] sm:$0xff]   ;;  %v5938_v31 = vld [vmem:[%s7099_s11 + $0x90] sm:$0xff]  }
0x122e   :  { %v5714_v50 = vpop.f32.mrf.mxu0  ;;  %3886 = vmatprep.mubr.bf16.mxu0 %v5971_v7 }
0x122f   :  { %v5934_v50 = vld [vmem:[%s7099_s11 + $0x98] sm:$0xff]  }
0x1230   :  { %5738 = vmatpush3.bf16.msra.mxu1 %v5888_v28  ;;  %v5935_v28 = vld [vmem:[%s7099_s11 + $0x50] sm:$0xff]  }
0x1231   :  { %5739 = vmatprep.subr.bf16.mxu1 %v5969_v25 }
0x1234   :  { %5740 = vmatpush3.bf16.msra.mxu1 %v5889_v29  ;;  %v5936_v29 = vld [vmem:[%s7099_s11 + $0xd0] sm:$0xff]  }
0x1235   :  { %5741 = vmatprep.subr.bf16.mxu1 %v5969_v25  ;;  %v5899_v25 = vld [vmem:[%s7097_s9 + $0x44] ss:$16 sps:$4 sm:$0xff]  }
0x1236   :  { %3864 = vmatprep.subr.bf16.mxu0 %v5899_v25  ;;  %v5941_v25 = vld [vmem:[%s7099_s11 + $0x8] sm:$0xff]  }
0x1237   :  { %3865 = vmatpush1.bf16.msra.mxu0 %v5897_v34  ;;  %v5942_v34 = vld [vmem:[%s7099_s11 + $0x88] sm:$0xff]  }
0x1238   :  { %5742 = vmatpush3.bf16.msra.mxu1 %v5890_v30  ;;  %3866 = vmatprep.subr.bf16.mxu0 %v5905_v63  ;;  %v5937_v30 = vld [vmem:[%s7099_s11 + $0x10] sm:$0xff]  }
0x1239   :  { %3903 = vmatprep.subr.bf16.mxu1 %v5896_v33  ;;  %v5940_v33 = vld [vmem:[%s7099_s11 + $0xc8] sm:$0xff]  }
0x123b   :  { %3867 = vmatpush1.bf16.msra.mxu0 %v5903_v1 }
0x123c   :  { %3868 = vmatprep.subr.bf16.mxu0 %v5911_v3 }
0x123f   :  { %3869 = vmatpush1.bf16.msra.mxu0 %v5909_v5 }
0x1240   :  { %5075 = vmatprep.subr.bf16.mxu0 %v5915_v8 }
0x12e3   :  { %v3470_v36 = vpop.f32.mrf.mxu1 }
0x12e4   :  { %v3476_v38 = vadd.f32 %v3470_v36, %v3353_v55  ;;  %v5920_v55 = vld [vmem:[%s7099_s11 + $0xf0] sm:$0xff]   ;;  %v5943_v36 = vld [vmem:[%s7099_s11 + $0x40] sm:$0xff]  }
0x12e5   :  { %v5705_v39 = vpop.f32.mrf.mxu1 }
0x12e6   :  { %v5945_v39 = vld [vmem:[%s7099_s11] sm:$0xff]  }
0x12e7   :  { %v3473_v41 = vpop.f32.mrf.mxu1 }
0x12e8   :  { %v5946_v41 = vld [vmem:[%s7099_s11 + $0x80] sm:$0xff]  }
0x12e9   :  { %v5706_v42 = vpop.f32.mrf.mxu1 }
0x12ea   :  { %v3751_v42 = vlaneseq }
0x12eb   :  { %v3593_v43 = vpop.f32.mrf.mxu0  ;;  %v3639_v45 = vpop.f32.mrf.mxu1 }
0x12ec   :  { %v3599_v48 = vadd.f32 %v3593_v43, %v3476_v38  ;;  %v3645_v51 = vpack.c.bf16 %v3639_v45, %v3639_v45  ;;  %v5944_v38 = vld [vmem:[%s7099_s11 + $0xc0] sm:$0xff]   ;;  %v3752_v43 = vshrl.u32 %v3751_v42, 7 }
0x12ed   :  { %v5733_v54 = vpop.f32.mrf.mxu1  ;;  %v5725_v57 = vpop.f32.mrf.mxu0 }
0x12ee   :  { %5744 = vmatmul.mubr.msk.bf16.vlgmr.msra.gmra.mxu1 %vm2751_vm4, %v3645_v51  ;;  %v3753_v45 = vsub.s32 0, %v3752_v43  ;;  %v3757_v51 = vsub.s32 1, %v3752_v43 }
0x12ef   :  { %v3642_v58 = vpop.f32.mrf.mxu1  ;;  %3904 = vmatpush1.bf16.msra.mxu1 %v5894_v46  ;;  %v3596_v53 = vpop.f32.mrf.mxu0  ;;  %3927 = vmatprep.mubr.bf16.mxu1 %v5971_v7  ;;  %v3761_v46 = vsub.s32 2, %v3752_v43 }
0x12f0   :  { %3905 = vmatprep.subr.bf16.mxu1 %v5902_v52  ;;  %v3765_v52 = vsub.s32 3, %v3752_v43 }
0x12f1   :  { %v5734_v37 = vpop.f32.mrf.mxu1  ;;  %v5726_v62 = vpop.f32.mrf.mxu0 }
0x12f3   :  { %3906 = vmatpush1.bf16.msra.mxu1 %v5900_v60 }
0x12f4   :  { %3907 = vmatprep.subr.bf16.mxu1 %v5908_v0 }
0x12f7   :  { %3908 = vmatpush1.bf16.msra.mxu1 %v5906_v2 }
0x12f8   :  { %3909 = vmatprep.subr.bf16.mxu1 %v5914_v4 }
0x12fb   :  { %3910 = vmatpush1.bf16.msra.mxu1 %v5912_v6 }
0x12fc   :  { %5097 = vmatprep.subr.bf16.mxu1 %v5916_v9 }
0x13ae   :  { %v3716_v10 = vpop.f32.mrf.mxu1 }
0x13af   :  { %v3722_v12 = vadd.f32 %v3716_v10, %v3599_v48  ;;  %v3749_v48 = vld [vmem:[%s7098_s10] sm:$0xf] }
0x13b0   :  { %v5745_v13 = vpop.f32.mrf.mxu1  ;;  %v3754_v54 = vrot.slane %v3749_v48, %v3753_v45  ;;  %v3762_v57 = vrot.slane %v3749_v48, %v3761_v46  ;;  %v3758_v58 = vrot.slane %v3749_v48, %v3757_v51  ;;  %v3766_v53 = vrot.slane %v3749_v48, %v3765_v52 }
0x13b1   :  { %v3730_v14 = vadd.f32 %v4663_v11, %v3722_v12 }
0x13b2   :  { %v3719_v15 = vpop.f32.mrf.mxu1 }
0x13b3   :  { %v3731_v16 = vmax.f32 %v3730_v14, 0.0 }
0x13b4   :  { %v5746_v35 = vpop.f32.mrf.mxu1 }
0x13b5   :  { %v3732_v59 = vpack.c.bf16 %v3731_v16, %v3731_v16 }
0x13b7   :  { %4680 = vmatmul.mubr.msk.bf16.vlgmr.msra.gmra.mxu0 %vm2751_vm4, %v3732_v59  ;;  %4681 = vmatmul.mubr.msk.bf16.vlgmr.msra.gmra.mxu1 %vm2751_vm4, %v3732_v59 }
0x13b8   :  { %5076 = vmatpush3.bf16.msra.mxu0 %v5917_v40  ;;  %5098 = vmatpush3.bf16.msra.mxu1 %v5918_v47  ;;  %v4682_v40 = vld [vmem:[%s7100_s12] ss:$0 sm:$0xff] }
0x13b9   :  { %5077 = vmatprep.subr.bf16.mxu0 %v5919_v56  ;;  %5099 = vmatprep.subr.bf16.mxu1 %v5920_v55 }
0x13bc   :  { %5078 = vmatpush3.bf16.msra.mxu0 %v5921_v61  ;;  %5100 = vmatpush3.bf16.msra.mxu1 %v5922_v17 }
0x13bd   :  { %5079 = vmatprep.subr.bf16.mxu0 %v5923_v18  ;;  %5101 = vmatprep.subr.bf16.mxu1 %v5924_v49 }
0x13c0   :  { %5080 = vmatpush3.bf16.msra.mxu0 %v5925_v19  ;;  %5102 = vmatpush3.bf16.msra.mxu1 %v5926_v20 }
0x13c1   :  { %5081 = vmatprep.subr.bf16.mxu0 %v5927_v21  ;;  %5103 = vmatprep.subr.bf16.mxu1 %v5928_v22 }
0x13c4   :  { %5082 = vmatpush3.bf16.msra.mxu0 %v5929_v23  ;;  %5104 = vmatpush3.bf16.msra.mxu1 %v5930_v44 }
0x13c5   :  { %5083 = vmatprep.subr.bf16.mxu0 %v5931_v24  ;;  %5105 = vmatprep.subr.bf16.mxu1 %v5932_v26 }
0x13c8   :  { %5084 = vmatpush3.bf16.msra.mxu0 %v5933_v27  ;;  %5106 = vmatpush3.bf16.msra.mxu1 %v5934_v50 }
0x13c9   :  { %5085 = vmatprep.subr.bf16.mxu0 %v5935_v28  ;;  %5107 = vmatprep.subr.bf16.mxu1 %v5936_v29 }
0x13cc   :  { %5086 = vmatpush3.bf16.msra.mxu0 %v5937_v30  ;;  %5108 = vmatpush3.bf16.msra.mxu1 %v5938_v31 }
0x13cd   :  { %5087 = vmatprep.subr.bf16.mxu0 %v5939_v32  ;;  %5109 = vmatprep.subr.bf16.mxu1 %v5940_v33 }
0x13d0   :  { %5088 = vmatpush3.bf16.msra.mxu0 %v5941_v25  ;;  %5110 = vmatpush3.bf16.msra.mxu1 %v5942_v34 }
0x13d1   :  { %5089 = vmatprep.subr.bf16.mxu0 %v5943_v36  ;;  %5111 = vmatprep.subr.bf16.mxu1 %v5944_v38 }
0x13d4   :  { %5090 = vmatpush3.bf16.msra.mxu0 %v5945_v39  ;;  %5112 = vmatpush3.bf16.msra.mxu1 %v5946_v41 }
0x1477   :  { %v3888_v60 = vpop.f32.mrf.mxu0  ;;  %v3929_v37 = vpop.f32.mrf.mxu1 }
0x1478   :  { %v3889_v62 = vadd.f32 %v3888_v60, %v3754_v54  ;;  %v3930_v63 = vadd.f32 %v3929_v37, %v3762_v57 }
0x1479   :  { %v3890_v0 = vpop.f32.mrf.mxu0  ;;  %v3931_v1 = vpop.f32.mrf.mxu1 }
0x147a   :  { %v3891_v2 = vadd.f32 %v3890_v0, %v3758_v58  ;;  %v3932_v3 = vadd.f32 %v3931_v1, %v3766_v53  ;;  %v3936_v4 = vmax.f32 %v3889_v62, 0.0  ;;  %v3938_v5 = vmax.f32 %v3930_v63, 0.0 }
0x147b   :  { %v3892_v6 = vpop.f32.mrf.mxu0  ;;  %v3933_v7 = vpop.f32.mrf.mxu1 }
0x147c   :  { %v3937_v8 = vmax.f32 %v3891_v2, 0.0  ;;  %v3939_v9 = vmax.f32 %v3932_v3, 0.0  ;;  %v3940_v14 = vpack.c.bf16 %v3936_v4, %v3936_v4  ;;  %v3942_v15 = vpack.c.bf16 %v3938_v5, %v3938_v5 }
0x147d   :  { %v3893_v10 = vpop.f32.mrf.mxu0  ;;  %v3934_v11 = vpop.f32.mrf.mxu1 }
0x147e   :  { %v3941_v12 = vpack.c.bf16 %v3937_v8, %v3937_v8  ;;  %v3943_v13 = vpack.c.bf16 %v3939_v9, %v3939_v9 }
0x1480   :  { %4239 = vmatprep.mubr.bf16.mxu0 %v3941_v12  ;;  %4279 = vmatprep.mubr.bf16.mxu1 %v3943_v13 }
0x1481   :  { %4240 = vmatmul.mubr.bf16.vlgmr.msra.gmra.mxu0 %v3940_v14  ;;  %4280 = vmatmul.mubr.bf16.vlgmr.msra.gmra.mxu1 %v3942_v15 }
0x1541   :  { %v5091_v16 = vpop.f32.mrf.mxu0  ;;  %v5113_v35 = vpop.f32.mrf.mxu1 }
0x1543   :  { %v5092_v47 = vpop.f32.mrf.mxu0  ;;  %v5114_v59 = vpop.f32.mrf.mxu1 }
0x1544   :  { %v5093_v56 = vadd.f32 %v5092_v47, %v5091_v16  ;;  %v5115_v18 = vadd.f32 %v5114_v59, %v5113_v35 }
0x1545   :  { %v5094_v55 = vpop.f32.mrf.mxu0  ;;  %v5116_v61 = vpop.f32.mrf.mxu1 }
0x1546   :  { %v4242_v17 = vadd.f32 %v5093_v56, %v4682_v40 }
0x1547   :  { %v5095_v49 = vpop.f32.mrf.mxu0  ;;  %v5117_v19 = vpop.f32.mrf.mxu1 }
0x1548   :  { %v4282_v20 = vadd.f32 %v5115_v18, %v4242_v17 }
0x154a   :  { %4287 = vst [vmem:[#allocation2] sm:$0x3] %v4282_v20 }
0x154b   :  { %5958 = shalt.err (!%p5955_p4)
}
0x154c   :  { %4297 = dma.vmem_to_hbm [thread:$0]  %s4295_s23, 32, %s7101_s13, [#allocation3]  }
0x154d   :  { %5967 = dma.done.wait [#allocation3], 32  }
0x154e   :  { %5968 = vsyncadd [#allocation3], 4294967264 }
0x154f   :  { %4301 = vsyncpa [#allocation3], 1 }

</bundles_post_ra>
